<compile_context>
chip_gen: v7x
topology: tpu7x:2x2x1
jax: 0.10.0
libtpu: 0.0.40
codegen_flags: <defaults>
</compile_context>

<pallas_src>
import functools

import jax
import jax.numpy as jnp
from jax.experimental import pallas as pl
from jax.experimental.pallas import tpu as pltpu


# ----------------------------- Pallas kernel -------------------------------

def _hetero_sage_layer_kernel(src_t_ref, dst_t_ref, first_ref, last_ref,   # SMEM scalar-prefetch
                              a_ref, xs_ref, xd_ref, dinv_ref,             # VMEM inputs
                              wl_ref, wr_ref, b_ref,
                              o_ref,                                       # VMEM output
                              acc_ref,                                     # VMEM scratch (f32)
                              *, apply_relu: bool, aggregate_first: bool):
    del src_t_ref, dst_t_ref  # only consumed by the BlockSpec index_maps
    e = pl.program_id(0)

    # Zero the f32 accumulator at the first edge type of each destination
    # node-type group (the cross-edge-type 'sum' of HeteroConv lives here).
    @pl.when(first_ref[e] == 1)
    def _init():
        acc_ref[...] = jnp.zeros_like(acc_ref)

    a = a_ref[...]        # (Nmax, Nmax)  bf16 edge counts (exact small ints)
    xs = xs_ref[...]      # (Nmax, Fin)   bf16 source-type features
    xd = xd_ref[...]      # (Nmax, Fin)   bf16 destination-type features
    wl = wl_ref[...]      # (Fin, Fout)   bf16
    wr = wr_ref[...]      # (Fin, Fout)   bf16
    dinv = dinv_ref[...]  # (Nmax, 1)     f32  1/in-degree (0 for isolated)

    if aggregate_first:
        # mean_aggr(X_src) @ W_l  ==  ((A @ X_src) * 1/deg) @ W_l
        agg = jnp.dot(a, xs, preferred_element_type=jnp.float32) * dinv
        neigh = jnp.dot(agg.astype(jnp.bfloat16), wl,
                        preferred_element_type=jnp.float32)
    else:
        # ==  (A @ (X_src @ W_l)) * 1/deg   (cheaper quadratic term if Fout<Fin)
        xw = jnp.dot(xs, wl, preferred_element_type=jnp.float32)
        neigh = jnp.dot(a, xw.astype(jnp.bfloat16),
                        preferred_element_type=jnp.float32) * dinv

    contrib = neigh + jnp.dot(xd, wr, preferred_element_type=jnp.float32)
    contrib = contrib + b_ref[...]            # (1, Fout) broadcasts over rows
    acc_ref[...] += contrib

    # Finalize (relu + cast + lane-dense store) once per destination group.
    @pl.when(last_ref[e] == 1)
    def _finalize():
        res = acc_ref[...]
        if apply_relu:
            res = jnp.maximum(res, 0.0)
        o_ref[...] = res.astype(o_ref.dtype)


def hetero_sage_layer_pallas(x_all, a_cnt, dinv, wl, wr, b,
                             src_t, dst_t, first, last,
                             *, f_in_true, f_out_true, apply_relu,
                             out_dtype=jnp.float32):
    """One fused HeteroConv({et: SAGEConv}, aggr='sum') layer (+ optional relu).

    x_all : (num_node_types, Nmax, Fin_pad) bf16   stacked, zero-padded features
    a_cnt : (num_edge_types, Nmax, Nmax)    bf16   dense edge-count adjacency
    dinv  : (num_edge_types, Nmax, 1)       f32    1/in-degree per dst row
    wl/wr : (num_edge_types, Fin_pad, Fout_pad) bf16
    b     : (num_edge_types, 1, Fout_pad)   f32
    src_t/dst_t/first/last : (num_edge_types,) int32, edge types sorted by dst
    """
    num_et, n_max, _ = a_cnt.shape
    num_nt = x_all.shape[0]
    f_in_pad = x_all.shape[2]
    f_out_pad = wl.shape[2]
    aggregate_first = f_in_true <= f_out_true   # pick cheaper association

    kernel = functools.partial(_hetero_sage_layer_kernel,
                               apply_relu=apply_relu,
                               aggregate_first=aggregate_first)

    grid_spec = pltpu.PrefetchScalarGridSpec(
        num_scalar_prefetch=4,
        grid=(num_et,),
        in_specs=[
            pl.BlockSpec((None, n_max, n_max),
                         lambda e, s, d, f, l: (e, 0, 0)),        # A counts
            pl.BlockSpec((None, n_max, f_in_pad),
                         lambda e, s, d, f, l: (s[e], 0, 0)),     # X[src type]
            pl.BlockSpec((None, n_max, f_in_pad),
                         lambda e, s, d, f, l: (d[e], 0, 0)),     # X[dst type]
            pl.BlockSpec((None, n_max, 1),
                         lambda e, s, d, f, l: (e, 0, 0)),        # 1/deg
            pl.BlockSpec((None, f_in_pad, f_out_pad),
                         lambda e, s, d, f, l: (e, 0, 0)),        # W_l
            pl.BlockSpec((None, f_in_pad, f_out_pad),
                         lambda e, s, d, f, l: (e, 0, 0)),        # W_r
            pl.BlockSpec((None, 1, f_out_pad),
                         lambda e, s, d, f, l: (e, 0, 0)),        # bias
        ],
        out_specs=pl.BlockSpec((None, n_max, f_out_pad),
                               lambda e, s, d, f, l: (d[e], 0, 0)),
        scratch_shapes=[pltpu.VMEM((n_max, f_out_pad), jnp.float32)],
    )

    return pl.pallas_call(
        kernel,
        out_shape=jax.ShapeDtypeStruct((num_nt, n_max, f_out_pad), out_dtype),
        grid_spec=grid_spec,
        compiler_params=pltpu.CompilerParams(
            dimension_semantics=("arbitrary",)),   # accumulation along grid
    )(src_t, dst_t, first, last, a_cnt, x_all, x_all, dinv, wl, wr, b)


# ------------------------------ JAX glue ------------------------------------

def _round_up(n, m):
    return ((n + m - 1) // m) * m


def _pad_to(x, shape):
    return jnp.pad(x, [(0, s - d) for d, s in zip(x.shape, shape)])


def stack_features(x_dict, nt_order, n_max, f_pad):
    mats = [_pad_to(x_dict[nt], (n_max, f_pad)) for nt in nt_order]
    return jnp.stack(mats).astype(jnp.bfloat16)


def stack_edge_params(params, ordered_ets, f_in_pad, f_out_pad):
    wls, wrs, bs = [], [], []
    for et in ordered_ets:
        w_l, w_r, bias = params[et]
        wls.append(_pad_to(w_l, (f_in_pad, f_out_pad)))
        wrs.append(_pad_to(w_r, (f_in_pad, f_out_pad)))
        bs.append(_pad_to(bias.reshape(1, -1), (1, f_out_pad)))
    return (jnp.stack(wls).astype(jnp.bfloat16),
            jnp.stack(wrs).astype(jnp.bfloat16),
            jnp.stack(bs).astype(jnp.float32))


def stack_adjacency(edge_index_dict, ordered_ets, n_max):
    cnts, dinvs = [], []
    for et in ordered_ets:
        src, dst = edge_index_dict[et][0], edge_index_dict[et][1]
        cnt = jnp.zeros((n_max, n_max), jnp.float32).at[dst, src].add(1.0)
        deg = cnt.sum(axis=1, keepdims=True)
        dinvs.append(jnp.where(deg > 0, 1.0 / jnp.maximum(deg, 1.0), 0.0))
        cnts.append(cnt)
    return jnp.stack(cnts).astype(jnp.bfloat16), jnp.stack(dinvs)


def init_sage_params(key, edge_types, f_in, f_out):
    params = {}
    for i, et in enumerate(edge_types):
        k1, k2, k3 = jax.random.split(jax.random.fold_in(key, i), 3)
        scale = 1.0 / jnp.sqrt(jnp.float32(f_in))
        w_l = jax.random.uniform(k1, (f_in, f_out), jnp.float32, -scale, scale)
        w_r = jax.random.uniform(k2, (f_in, f_out), jnp.float32, -scale, scale)
        b = jax.random.uniform(k3, (f_out,), jnp.float32, -scale, scale)
        params[et] = (w_l, w_r, b)
    return params


@functools.partial(jax.jit, static_argnames=("in_channels", "hidden_channels",
                                              "out_channels"))
def graphsage_forward(x_all, a_cnt, dinv, l1, l2, src_t, dst_t, first, last,
                      *, in_channels, hidden_channels, out_channels):
    wl1, wr1, b1 = l1
    wl2, wr2, b2 = l2
    # conv1 + fused cross-edge-type sum + fused relu; emit bf16 so layer 2's
    # MXU operands need no extra cast op.
    h = hetero_sage_layer_pallas(
        x_all, a_cnt, dinv, wl1, wr1, b1, src_t, dst_t, first, last,
        f_in_true=in_channels, f_out_true=hidden_channels,
        apply_relu=True, out_dtype=jnp.bfloat16)
    # conv2 + fused sum, f32 output (matches the PyTorch module's output dtype)
    out = hetero_sage_layer_pallas(
        h, a_cnt, dinv, wl2, wr2, b2, src_t, dst_t, first, last,
        f_in_true=hidden_channels, f_out_true=out_channels,
        apply_relu=False, out_dtype=jnp.float32)
    return out


def reference_forward(x_dict, edge_index_dict, params1, params2, node_types):
    """Pure-JAX f32 reference of the PyTorch module (for a sanity check)."""
    def layer(xd, params, relu):
        out = {}
        for et, (wl, wr, bias) in params.items():
            s, _, d = et
            src, dst = edge_index_dict[et][0], edge_index_dict[et][1]
            cnt = jnp.zeros((node_types[d], node_types[s]),
                            jnp.float32).at[dst, src].add(1.0)
            deg = cnt.sum(axis=1, keepdims=True)
            a = jnp.where(deg > 0, cnt / jnp.maximum(deg, 1.0), 0.0)
            y = a @ xd[s] @ wl + xd[d] @ wr + bias
            out[d] = out[d] + y if d in out else y
        if relu:
            out = {k: jnp.maximum(v, 0.0) for k, v in out.items()}
        return out
    h = layer(x_dict, params1, True)
    return layer(h, params2, False)


# --------------------------------- main --------------------------------------

if __name__ == "__main__":
    key = jax.random.PRNGKey(0)

    # Synthetic heterogeneous graph metadata (small shapes).
    node_types = {"user": 8, "item": 8}
    edge_types = [("user", "buys", "item"), ("item", "rev_buys", "user")]
    in_channels, hidden_channels, out_channels = 16, 32, 16
    n_edges = 24

    k_feat, k_edge, k_p1, k_p2 = jax.random.split(key, 4)

    # Node features.
    x_dict = {}
    for i, (nt, n) in enumerate(node_types.items()):
        x_dict[nt] = jax.random.normal(jax.random.fold_in(k_feat, i),
                                       (n, in_channels), jnp.float32)

    # Edge indices per edge type: edge_index[0]=src ids, [1]=dst ids.
    edge_index_dict = {}
    for i, et in enumerate(edge_types):
        s, _, d = et
        ks, kd = jax.random.split(jax.random.fold_in(k_edge, i))
        src = jax.random.randint(ks, (n_edges,), 0, node_types[s])
        dst = jax.random.randint(kd, (n_edges,), 0, node_types[d])
        edge_index_dict[et] = jnp.stack([src, dst])

    # Deterministic parameters for both HeteroConv layers.
    params1 = init_sage_params(k_p1, edge_types, in_channels, hidden_channels)
    params2 = init_sage_params(k_p2, edge_types, hidden_channels, out_channels)

    # ---- pack everything into padded / stacked device operands ----
    nt_order = list(node_types.keys())
    nt_index = {nt: i for i, nt in enumerate(nt_order)}
    n_max = _round_up(max(node_types.values()), 16)   # bf16 sublane packing
    f_in_pad = _round_up(in_channels, 128)            # lane-dense feature dims
    f_hid_pad = _round_up(hidden_channels, 128)
    f_out_pad = _round_up(out_channels, 128)

    # Edge types sorted by destination node type so the output block index is
    # piecewise-constant along the grid (VMEM-resident accumulator per group).
    ordered_ets = sorted(edge_types, key=lambda et: nt_index[et[2]])
    dst_ids = [nt_index[et[2]] for et in ordered_ets]
    num_et = len(ordered_ets)
    src_t = jnp.array([nt_index[et[0]] for et in ordered_ets], jnp.int32)
    dst_t = jnp.array(dst_ids, jnp.int32)
    first = jnp.array([1 if (i == 0 or dst_ids[i] != dst_ids[i - 1]) else 0
                       for i in range(num_et)], jnp.int32)
    last = jnp.array([1 if (i == num_et - 1 or dst_ids[i] != dst_ids[i + 1])
                      else 0 for i in range(num_et)], jnp.int32)

    a_cnt, dinv = stack_adjacency(edge_index_dict, ordered_ets, n_max)
    x_all = stack_features(x_dict, nt_order, n_max, f_in_pad)
    l1 = stack_edge_params(params1, ordered_ets, f_in_pad, f_hid_pad)
    l2 = stack_edge_params(params2, ordered_ets, f_hid_pad, f_out_pad)

    out_all = graphsage_forward(x_all, a_cnt, dinv, l1, l2,
                                src_t, dst_t, first, last,
                                in_channels=in_channels,
                                hidden_channels=hidden_channels,
                                out_channels=out_channels)
    out_all = jax.block_until_ready(out_all)

    # Output dict: only destination node types (mirrors HeteroConv), unpadded.
    dst_types = sorted({et[2] for et in edge_types}, key=lambda nt: nt_index[nt])
    out_dict = {nt: out_all[nt_index[nt], :node_types[nt], :out_channels]
                for nt in dst_types}

    # Sanity: shapes + agreement with a pure-JAX f32 reference (bf16 operands
    # with f32 accumulation => loose tolerance).
    ref = reference_forward(x_dict, edge_index_dict, params1, params2,
                            node_types)
    for nt in dst_types:
        assert out_dict[nt].shape == (node_types[nt], out_channels)
        assert out_dict[nt].dtype == jnp.float32
        assert bool(jnp.allclose(out_dict[nt], ref[nt], rtol=0.1, atol=0.1)), nt

    print("KERNEL_OK")
</pallas_src>

<mosaic_0001>
module attributes {stable_mosaic.version = 11 : i64} {
  func.func @_hetero_sage_layer_kernel(%arg0: i32, %arg1: memref<2xi32, #tpu.memory_space<smem>>, %arg2: memref<2xi32, #tpu.memory_space<smem>>, %arg3: memref<2xi32, #tpu.memory_space<smem>>, %arg4: memref<2xi32, #tpu.memory_space<smem>>, %arg5: memref<1x16x16xbf16, #tpu.memory_space<vmem>>, %arg6: memref<1x16x128xbf16, #tpu.memory_space<vmem>>, %arg7: memref<1x16x128xbf16, #tpu.memory_space<vmem>>, %arg8: memref<1x16x1xf32, #tpu.memory_space<vmem>>, %arg9: memref<1x128x128xbf16, #tpu.memory_space<vmem>>, %arg10: memref<1x128x128xbf16, #tpu.memory_space<vmem>>, %arg11: memref<1x1x128xf32, #tpu.memory_space<vmem>>, %arg12: memref<1x16x128xf32, #tpu.memory_space<vmem>>, %arg13: memref<16x128xf32, #tpu.memory_space<vmem>>) attributes {dimension_semantics = [#tpu.dimension_semantics<arbitrary>], iteration_bounds = array<i64: 2>, scalar_prefetch = 4 : i64, scratch_operands = 1 : i64, tpu.core_type = #tpu.core_type<tc>, window_params = [{transform_indices = @transform_0, window_bounds = array<i64: 1, 16, 16>}, {transform_indices = @transform_1, window_bounds = array<i64: 1, 16, 128>}, {transform_indices = @transform_2, window_bounds = array<i64: 1, 16, 128>}, {transform_indices = @transform_3, window_bounds = array<i64: 1, 16, 1>}, {transform_indices = @transform_4, window_bounds = array<i64: 1, 128, 128>}, {transform_indices = @transform_5, window_bounds = array<i64: 1, 128, 128>}, {transform_indices = @transform_6, window_bounds = array<i64: 1, 1, 128>}, {transform_indices = @transform_7, window_bounds = array<i64: 1, 16, 128>}]} {
    %0 = arith.index_cast %arg0 : i32 to index
    %1 = memref.load %arg3[%0] : memref<2xi32, #tpu.memory_space<smem>>
    %c1_i32 = arith.constant 1 : i32
    %2 = arith.cmpi eq, %1, %c1_i32 : i32
    %3 = arith.extui %2 : i1 to i32
    %c0_i32 = arith.constant 0 : i32
    %4 = arith.cmpi ne, %3, %c0_i32 : i32
    scf.if %4 {
      %cst_28 = arith.constant 0.000000e+00 : f32
      %36 = vector.broadcast %cst_28 : f32 to vector<16x128xf32>
      %c0_29 = arith.constant 0 : index
      %c0_30 = arith.constant 0 : index
      %37 = vector.load %arg13[%c0_29, %c0_30] : memref<16x128xf32, #tpu.memory_space<vmem>>, vector<16x128xf32>
      tpu.vector_store %arg13[%c0_29, %c0_30], %36 {strides = array<i32>} : memref<16x128xf32, #tpu.memory_space<vmem>>, vector<16x128xf32>,
    } else {
    }
    %c0 = arith.constant 0 : index
    %c0_0 = arith.constant 0 : index
    %c0_1 = arith.constant 0 : index
    %5 = vector.load %arg5[%c0, %c0_0, %c0_1] : memref<1x16x16xbf16, #tpu.memory_space<vmem>>, vector<1x16x16xbf16>
    %6 = vector.shape_cast %5 : vector<1x16x16xbf16> to vector<16x16xbf16>
    %c0_2 = arith.constant 0 : index
    %c0_3 = arith.constant 0 : index
    %c0_4 = arith.constant 0 : index
    %7 = vector.load %arg6[%c0_2, %c0_3, %c0_4] : memref<1x16x128xbf16, #tpu.memory_space<vmem>>, vector<1x16x128xbf16>
    %8 = vector.shape_cast %7 : vector<1x16x128xbf16> to vector<16x128xbf16>
    %c0_5 = arith.constant 0 : index
    %c0_6 = arith.constant 0 : index
    %c0_7 = arith.constant 0 : index
    %9 = vector.load %arg7[%c0_5, %c0_6, %c0_7] : memref<1x16x128xbf16, #tpu.memory_space<vmem>>, vector<1x16x128xbf16>
    %10 = vector.shape_cast %9 : vector<1x16x128xbf16> to vector<16x128xbf16>
    %c0_8 = arith.constant 0 : index
    %c0_9 = arith.constant 0 : index
    %c0_10 = arith.constant 0 : index
    %11 = vector.load %arg9[%c0_8, %c0_9, %c0_10] : memref<1x128x128xbf16, #tpu.memory_space<vmem>>, vector<1x128x128xbf16>
    %12 = vector.shape_cast %11 : vector<1x128x128xbf16> to vector<128x128xbf16>
    %c0_11 = arith.constant 0 : index
    %c0_12 = arith.constant 0 : index
    %c0_13 = arith.constant 0 : index
    %13 = vector.load %arg10[%c0_11, %c0_12, %c0_13] : memref<1x128x128xbf16, #tpu.memory_space<vmem>>, vector<1x128x128xbf16>
    %14 = vector.shape_cast %13 : vector<1x128x128xbf16> to vector<128x128xbf16>
    %c0_14 = arith.constant 0 : index
    %c0_15 = arith.constant 0 : index
    %c0_16 = arith.constant 0 : index
    %15 = vector.load %arg8[%c0_14, %c0_15, %c0_16] : memref<1x16x1xf32, #tpu.memory_space<vmem>>, vector<1x16x1xf32>
    %16 = vector.shape_cast %15 : vector<1x16x1xf32> to vector<16x1xf32>
    %cst = arith.constant dense<0.000000e+00> : vector<16x128xf32>
    %17 = tpu.matmul %8, %12, %cst {dimension_numbers = #tpu.dot_dimension_numbers<[1], [0], [0], [1], [0, 0, 1, 1], [], []>} : vector<16x128xbf16>, vector<128x128xbf16>, vector<16x128xf32> -> vector<16x128xf32>
    %18 = arith.truncf %17 : vector<16x128xf32> to vector<16x128xbf16>
    %cst_17 = arith.constant dense<0.000000e+00> : vector<16x128xf32>
    %19 = tpu.matmul %6, %18, %cst_17 {dimension_numbers = #tpu.dot_dimension_numbers<[1], [0], [0], [1], [0, 0, 1, 1], [], []>} : vector<16x16xbf16>, vector<16x128xbf16>, vector<16x128xf32> -> vector<16x128xf32>
    %20 = vector.broadcast %16 : vector<16x1xf32> to vector<16x128xf32>
    %21 = arith.mulf %19, %20 : vector<16x128xf32>
    %cst_18 = arith.constant dense<0.000000e+00> : vector<16x128xf32>
    %22 = tpu.matmul %10, %14, %cst_18 {dimension_numbers = #tpu.dot_dimension_numbers<[1], [0], [0], [1], [0, 0, 1, 1], [], []>} : vector<16x128xbf16>, vector<128x128xbf16>, vector<16x128xf32> -> vector<16x128xf32>
    %23 = arith.addf %21, %22 : vector<16x128xf32>
    %c0_19 = arith.constant 0 : index
    %c0_20 = arith.constant 0 : index
    %c0_21 = arith.constant 0 : index
    %24 = vector.load %arg11[%c0_19, %c0_20, %c0_21] : memref<1x1x128xf32, #tpu.memory_space<vmem>>, vector<1x1x128xf32>
    %25 = vector.shape_cast %24 : vector<1x1x128xf32> to vector<1x128xf32>
    %26 = vector.broadcast %25 : vector<1x128xf32> to vector<16x128xf32>
    %27 = arith.addf %23, %26 : vector<16x128xf32>
    %c0_22 = arith.constant 0 : index
    %c0_23 = arith.constant 0 : index
    %28 = vector.load %arg13[%c0_22, %c0_23] : memref<16x128xf32, #tpu.memory_space<vmem>>, vector<16x128xf32>
    %29 = arith.addf %28, %27 : vector<16x128xf32>
    %c0_24 = arith.constant 0 : index
    %c0_25 = arith.constant 0 : index
    %30 = vector.load %arg13[%c0_24, %c0_25] : memref<16x128xf32, #tpu.memory_space<vmem>>, vector<16x128xf32>
    tpu.vector_store %arg13[%c0_24, %c0_25], %29 {strides = array<i32>} : memref<16x128xf32, #tpu.memory_space<vmem>>, vector<16x128xf32>,
    %31 = arith.index_cast %arg0 : i32 to index
    %32 = memref.load %arg4[%31] : memref<2xi32, #tpu.memory_space<smem>>
    %c1_i32_26 = arith.constant 1 : i32
    %33 = arith.cmpi eq, %32, %c1_i32_26 : i32
    %34 = arith.extui %33 : i1 to i32
    %c0_i32_27 = arith.constant 0 : i32
    %35 = arith.cmpi ne, %34, %c0_i32_27 : i32
    scf.if %35 {
      %c0_28 = arith.constant 0 : index
      %c0_29 = arith.constant 0 : index
      %36 = vector.load %arg13[%c0_28, %c0_29] : memref<16x128xf32, #tpu.memory_space<vmem>>, vector<16x128xf32>
      %c0_30 = arith.constant 0 : index
      %c0_31 = arith.constant 0 : index
      %c0_32 = arith.constant 0 : index
      %37 = vector.load %arg12[%c0_30, %c0_31, %c0_32] : memref<1x16x128xf32, #tpu.memory_space<vmem>>, vector<1x16x128xf32>
      %38 = vector.shape_cast %37 : vector<1x16x128xf32> to vector<16x128xf32>
      %39 = vector.shape_cast %36 : vector<16x128xf32> to vector<1x16x128xf32>
      tpu.vector_store %arg12[%c0_30, %c0_31, %c0_32], %39 {strides = array<i32>} : memref<1x16x128xf32, #tpu.memory_space<vmem>>, vector<1x16x128xf32>,
    } else {
    }
    return
  }
  func.func @transform_0(%arg0: i32, %arg1: memref<2xi32, #tpu.memory_space<smem>>, %arg2: memref<2xi32, #tpu.memory_space<smem>>, %arg3: memref<2xi32, #tpu.memory_space<smem>>, %arg4: memref<2xi32, #tpu.memory_space<smem>>) -> (i32, i32, i32) {
    %c0_i32 = arith.constant 0 : i32
    %c0_i32_0 = arith.constant 0 : i32
    %c0_i32_1 = arith.constant 0 : i32
    return %arg0, %c0_i32, %c0_i32_0 : i32, i32, i32
  }
  func.func @transform_1(%arg0: i32, %arg1: memref<2xi32, #tpu.memory_space<smem>>, %arg2: memref<2xi32, #tpu.memory_space<smem>>, %arg3: memref<2xi32, #tpu.memory_space<smem>>, %arg4: memref<2xi32, #tpu.memory_space<smem>>) -> (i32, i32, i32) {
    %0 = arith.index_cast %arg0 : i32 to index
    %1 = memref.load %arg1[%0] : memref<2xi32, #tpu.memory_space<smem>>
    %c0_i32 = arith.constant 0 : i32
    %c0_i32_0 = arith.constant 0 : i32
    %c0_i32_1 = arith.constant 0 : i32
    return %1, %c0_i32, %c0_i32_0 : i32, i32, i32
  }
  func.func @transform_2(%arg0: i32, %arg1: memref<2xi32, #tpu.memory_space<smem>>, %arg2: memref<2xi32, #tpu.memory_space<smem>>, %arg3: memref<2xi32, #tpu.memory_space<smem>>, %arg4: memref<2xi32, #tpu.memory_space<smem>>) -> (i32, i32, i32) {
    %0 = arith.index_cast %arg0 : i32 to index
    %1 = memref.load %arg2[%0] : memref<2xi32, #tpu.memory_space<smem>>
    %c0_i32 = arith.constant 0 : i32
    %c0_i32_0 = arith.constant 0 : i32
    %c0_i32_1 = arith.constant 0 : i32
    return %1, %c0_i32, %c0_i32_0 : i32, i32, i32
  }
  func.func @transform_3(%arg0: i32, %arg1: memref<2xi32, #tpu.memory_space<smem>>, %arg2: memref<2xi32, #tpu.memory_space<smem>>, %arg3: memref<2xi32, #tpu.memory_space<smem>>, %arg4: memref<2xi32, #tpu.memory_space<smem>>) -> (i32, i32, i32) {
    %c0_i32 = arith.constant 0 : i32
    %c0_i32_0 = arith.constant 0 : i32
    %c0_i32_1 = arith.constant 0 : i32
    return %arg0, %c0_i32, %c0_i32_0 : i32, i32, i32
  }
  func.func @transform_4(%arg0: i32, %arg1: memref<2xi32, #tpu.memory_space<smem>>, %arg2: memref<2xi32, #tpu.memory_space<smem>>, %arg3: memref<2xi32, #tpu.memory_space<smem>>, %arg4: memref<2xi32, #tpu.memory_space<smem>>) -> (i32, i32, i32) {
    %c0_i32 = arith.constant 0 : i32
    %c0_i32_0 = arith.constant 0 : i32
    %c0_i32_1 = arith.constant 0 : i32
    return %arg0, %c0_i32, %c0_i32_0 : i32, i32, i32
  }
  func.func @transform_5(%arg0: i32, %arg1: memref<2xi32, #tpu.memory_space<smem>>, %arg2: memref<2xi32, #tpu.memory_space<smem>>, %arg3: memref<2xi32, #tpu.memory_space<smem>>, %arg4: memref<2xi32, #tpu.memory_space<smem>>) -> (i32, i32, i32) {
    %c0_i32 = arith.constant 0 : i32
    %c0_i32_0 = arith.constant 0 : i32
    %c0_i32_1 = arith.constant 0 : i32
    return %arg0, %c0_i32, %c0_i32_0 : i32, i32, i32
  }
  func.func @transform_6(%arg0: i32, %arg1: memref<2xi32, #tpu.memory_space<smem>>, %arg2: memref<2xi32, #tpu.memory_space<smem>>, %arg3: memref<2xi32, #tpu.memory_space<smem>>, %arg4: memref<2xi32, #tpu.memory_space<smem>>) -> (i32, i32, i32) {
    %c0_i32 = arith.constant 0 : i32
    %c0_i32_0 = arith.constant 0 : i32
    %c0_i32_1 = arith.constant 0 : i32
    return %arg0, %c0_i32, %c0_i32_0 : i32, i32, i32
  }
  func.func @transform_7(%arg0: i32, %arg1: memref<2xi32, #tpu.memory_space<smem>>, %arg2: memref<2xi32, #tpu.memory_space<smem>>, %arg3: memref<2xi32, #tpu.memory_space<smem>>, %arg4: memref<2xi32, #tpu.memory_space<smem>>) -> (i32, i32, i32) {
    %0 = arith.index_cast %arg0 : i32 to index
    %1 = memref.load %arg2[%0] : memref<2xi32, #tpu.memory_space<smem>>
    %c0_i32 = arith.constant 0 : i32
    %c0_i32_0 = arith.constant 0 : i32
    %c0_i32_1 = arith.constant 0 : i32
    return %1, %c0_i32, %c0_i32_0 : i32, i32, i32
  }
}

module attributes {stable_mosaic.version = 11 : i64} {
  func.func @_hetero_sage_layer_kernel(%arg0: i32, %arg1: memref<2xi32, #tpu.memory_space<smem>>, %arg2: memref<2xi32, #tpu.memory_space<smem>>, %arg3: memref<2xi32, #tpu.memory_space<smem>>, %arg4: memref<2xi32, #tpu.memory_space<smem>>, %arg5: memref<1x16x16xbf16, #tpu.memory_space<vmem>>, %arg6: memref<1x16x128xbf16, #tpu.memory_space<vmem>>, %arg7: memref<1x16x128xbf16, #tpu.memory_space<vmem>>, %arg8: memref<1x16x1xf32, #tpu.memory_space<vmem>>, %arg9: memref<1x128x128xbf16, #tpu.memory_space<vmem>>, %arg10: memref<1x128x128xbf16, #tpu.memory_space<vmem>>, %arg11: memref<1x1x128xf32, #tpu.memory_space<vmem>>, %arg12: memref<1x16x128xbf16, #tpu.memory_space<vmem>>, %arg13: memref<16x128xf32, #tpu.memory_space<vmem>>) attributes {dimension_semantics = [#tpu.dimension_semantics<arbitrary>], iteration_bounds = array<i64: 2>, scalar_prefetch = 4 : i64, scratch_operands = 1 : i64, tpu.core_type = #tpu.core_type<tc>, window_params = [{transform_indices = @transform_0, window_bounds = array<i64: 1, 16, 16>}, {transform_indices = @transform_1, window_bounds = array<i64: 1, 16, 128>}, {transform_indices = @transform_2, window_bounds = array<i64: 1, 16, 128>}, {transform_indices = @transform_3, window_bounds = array<i64: 1, 16, 1>}, {transform_indices = @transform_4, window_bounds = array<i64: 1, 128, 128>}, {transform_indices = @transform_5, window_bounds = array<i64: 1, 128, 128>}, {transform_indices = @transform_6, window_bounds = array<i64: 1, 1, 128>}, {transform_indices = @transform_7, window_bounds = array<i64: 1, 16, 128>}]} {
    %0 = arith.index_cast %arg0 : i32 to index
    %1 = memref.load %arg3[%0] : memref<2xi32, #tpu.memory_space<smem>>
    %c1_i32 = arith.constant 1 : i32
    %2 = arith.cmpi eq, %1, %c1_i32 : i32
    %3 = arith.extui %2 : i1 to i32
    %c0_i32 = arith.constant 0 : i32
    %4 = arith.cmpi ne, %3, %c0_i32 : i32
    scf.if %4 {
      %cst_28 = arith.constant 0.000000e+00 : f32
      %36 = vector.broadcast %cst_28 : f32 to vector<16x128xf32>
      %c0_29 = arith.constant 0 : index
      %c0_30 = arith.constant 0 : index
      %37 = vector.load %arg13[%c0_29, %c0_30] : memref<16x128xf32, #tpu.memory_space<vmem>>, vector<16x128xf32>
      tpu.vector_store %arg13[%c0_29, %c0_30], %36 {strides = array<i32>} : memref<16x128xf32, #tpu.memory_space<vmem>>, vector<16x128xf32>,
    } else {
    }
    %c0 = arith.constant 0 : index
    %c0_0 = arith.constant 0 : index
    %c0_1 = arith.constant 0 : index
    %5 = vector.load %arg5[%c0, %c0_0, %c0_1] : memref<1x16x16xbf16, #tpu.memory_space<vmem>>, vector<1x16x16xbf16>
    %6 = vector.shape_cast %5 : vector<1x16x16xbf16> to vector<16x16xbf16>
    %c0_2 = arith.constant 0 : index
    %c0_3 = arith.constant 0 : index
    %c0_4 = arith.constant 0 : index
    %7 = vector.load %arg6[%c0_2, %c0_3, %c0_4] : memref<1x16x128xbf16, #tpu.memory_space<vmem>>, vector<1x16x128xbf16>
    %8 = vector.shape_cast %7 : vector<1x16x128xbf16> to vector<16x128xbf16>
    %c0_5 = arith.constant 0 : index
    %c0_6 = arith.constant 0 : index
    %c0_7 = arith.constant 0 : index
    %9 = vector.load %arg7[%c0_5, %c0_6, %c0_7] : memref<1x16x128xbf16, #tpu.memory_space<vmem>>, vector<1x16x128xbf16>
    %10 = vector.shape_cast %9 : vector<1x16x128xbf16> to vector<16x128xbf16>
    %c0_8 = arith.constant 0 : index
    %c0_9 = arith.constant 0 : index
    %c0_10 = arith.constant 0 : index
    %11 = vector.load %arg9[%c0_8, %c0_9, %c0_10] : memref<1x128x128xbf16, #tpu.memory_space<vmem>>, vector<1x128x128xbf16>
    %12 = vector.shape_cast %11 : vector<1x128x128xbf16> to vector<128x128xbf16>
    %c0_11 = arith.constant 0 : index
    %c0_12 = arith.constant 0 : index
    %c0_13 = arith.constant 0 : index
    %13 = vector.load %arg10[%c0_11, %c0_12, %c0_13] : memref<1x128x128xbf16, #tpu.memory_space<vmem>>, vector<1x128x128xbf16>
    %14 = vector.shape_cast %13 : vector<1x128x128xbf16> to vector<128x128xbf16>
    %c0_14 = arith.constant 0 : index
    %c0_15 = arith.constant 0 : index
    %c0_16 = arith.constant 0 : index
    %15 = vector.load %arg8[%c0_14, %c0_15, %c0_16] : memref<1x16x1xf32, #tpu.memory_space<vmem>>, vector<1x16x1xf32>
    %16 = vector.shape_cast %15 : vector<1x16x1xf32> to vector<16x1xf32>
    %cst = arith.constant dense<0.000000e+00> : vector<16x128xf32>
    %17 = tpu.matmul %6, %8, %cst {dimension_numbers = #tpu.dot_dimension_numbers<[1], [0], [0], [1], [0, 0, 1, 1], [], []>} : vector<16x16xbf16>, vector<16x128xbf16>, vector<16x128xf32> -> vector<16x128xf32>
    %18 = vector.broadcast %16 : vector<16x1xf32> to vector<16x128xf32>
    %19 = arith.mulf %17, %18 : vector<16x128xf32>
    %20 = arith.truncf %19 : vector<16x128xf32> to vector<16x128xbf16>
    %cst_17 = arith.constant dense<0.000000e+00> : vector<16x128xf32>
    %21 = tpu.matmul %20, %12, %cst_17 {dimension_numbers = #tpu.dot_dimension_numbers<[1], [0], [0], [1], [0, 0, 1, 1], [], []>} : vector<16x128xbf16>, vector<128x128xbf16>, vector<16x128xf32> -> vector<16x128xf32>
    %cst_18 = arith.constant dense<0.000000e+00> : vector<16x128xf32>
    %22 = tpu.matmul %10, %14, %cst_18 {dimension_numbers = #tpu.dot_dimension_numbers<[1], [0], [0], [1], [0, 0, 1, 1], [], []>} : vector<16x128xbf16>, vector<128x128xbf16>, vector<16x128xf32> -> vector<16x128xf32>
    %23 = arith.addf %21, %22 : vector<16x128xf32>
    %c0_19 = arith.constant 0 : index
    %c0_20 = arith.constant 0 : index
    %c0_21 = arith.constant 0 : index
    %24 = vector.load %arg11[%c0_19, %c0_20, %c0_21] : memref<1x1x128xf32, #tpu.memory_space<vmem>>, vector<1x1x128xf32>
    %25 = vector.shape_cast %24 : vector<1x1x128xf32> to vector<1x128xf32>
    %26 = vector.broadcast %25 : vector<1x128xf32> to vector<16x128xf32>
    %27 = arith.addf %23, %26 : vector<16x128xf32>
    %c0_22 = arith.constant 0 : index
    %c0_23 = arith.constant 0 : index
    %28 = vector.load %arg13[%c0_22, %c0_23] : memref<16x128xf32, #tpu.memory_space<vmem>>, vector<16x128xf32>
    %29 = arith.addf %28, %27 : vector<16x128xf32>
    %c0_24 = arith.constant 0 : index
    %c0_25 = arith.constant 0 : index
    %30 = vector.load %arg13[%c0_24, %c0_25] : memref<16x128xf32, #tpu.memory_space<vmem>>, vector<16x128xf32>
    tpu.vector_store %arg13[%c0_24, %c0_25], %29 {strides = array<i32>} : memref<16x128xf32, #tpu.memory_space<vmem>>, vector<16x128xf32>,
    %31 = arith.index_cast %arg0 : i32 to index
    %32 = memref.load %arg4[%31] : memref<2xi32, #tpu.memory_space<smem>>
    %c1_i32_26 = arith.constant 1 : i32
    %33 = arith.cmpi eq, %32, %c1_i32_26 : i32
    %34 = arith.extui %33 : i1 to i32
    %c0_i32_27 = arith.constant 0 : i32
    %35 = arith.cmpi ne, %34, %c0_i32_27 : i32
    scf.if %35 {
      %c0_28 = arith.constant 0 : index
      %c0_29 = arith.constant 0 : index
      %36 = vector.load %arg13[%c0_28, %c0_29] : memref<16x128xf32, #tpu.memory_space<vmem>>, vector<16x128xf32>
      %cst_30 = arith.constant 0.000000e+00 : f32
      %37 = vector.broadcast %cst_30 : f32 to vector<16x128xf32>
      %38 = arith.maximumf %36, %37 : vector<16x128xf32>
      %39 = arith.truncf %38 : vector<16x128xf32> to vector<16x128xbf16>
      %c0_31 = arith.constant 0 : index
      %c0_32 = arith.constant 0 : index
      %c0_33 = arith.constant 0 : index
      %40 = vector.load %arg12[%c0_31, %c0_32, %c0_33] : memref<1x16x128xbf16, #tpu.memory_space<vmem>>, vector<1x16x128xbf16>
      %41 = vector.shape_cast %40 : vector<1x16x128xbf16> to vector<16x128xbf16>
      %42 = vector.shape_cast %39 : vector<16x128xbf16> to vector<1x16x128xbf16>
      tpu.vector_store %arg12[%c0_31, %c0_32, %c0_33], %42 {strides = array<i32>} : memref<1x16x128xbf16, #tpu.memory_space<vmem>>, vector<1x16x128xbf16>,
    } else {
    }
    return
  }
  func.func @transform_0(%arg0: i32, %arg1: memref<2xi32, #tpu.memory_space<smem>>, %arg2: memref<2xi32, #tpu.memory_space<smem>>, %arg3: memref<2xi32, #tpu.memory_space<smem>>, %arg4: memref<2xi32, #tpu.memory_space<smem>>) -> (i32, i32, i32) {
    %c0_i32 = arith.constant 0 : i32
    %c0_i32_0 = arith.constant 0 : i32
    %c0_i32_1 = arith.constant 0 : i32
    return %arg0, %c0_i32, %c0_i32_0 : i32, i32, i32
  }
  func.func @transform_1(%arg0: i32, %arg1: memref<2xi32, #tpu.memory_space<smem>>, %arg2: memref<2xi32, #tpu.memory_space<smem>>, %arg3: memref<2xi32, #tpu.memory_space<smem>>, %arg4: memref<2xi32, #tpu.memory_space<smem>>) -> (i32, i32, i32) {
    %0 = arith.index_cast %arg0 : i32 to index
    %1 = memref.load %arg1[%0] : memref<2xi32, #tpu.memory_space<smem>>
    %c0_i32 = arith.constant 0 : i32
    %c0_i32_0 = arith.constant 0 : i32
    %c0_i32_1 = arith.constant 0 : i32
    return %1, %c0_i32, %c0_i32_0 : i32, i32, i32
  }
  func.func @transform_2(%arg0: i32, %arg1: memref<2xi32, #tpu.memory_space<smem>>, %arg2: memref<2xi32, #tpu.memory_space<smem>>, %arg3: memref<2xi32, #tpu.memory_space<smem>>, %arg4: memref<2xi32, #tpu.memory_space<smem>>) -> (i32, i32, i32) {
    %0 = arith.index_cast %arg0 : i32 to index
    %1 = memref.load %arg2[%0] : memref<2xi32, #tpu.memory_space<smem>>
    %c0_i32 = arith.constant 0 : i32
    %c0_i32_0 = arith.constant 0 : i32
    %c0_i32_1 = arith.constant 0 : i32
    return %1, %c0_i32, %c0_i32_0 : i32, i32, i32
  }
  func.func @transform_3(%arg0: i32, %arg1: memref<2xi32, #tpu.memory_space<smem>>, %arg2: memref<2xi32, #tpu.memory_space<smem>>, %arg3: memref<2xi32, #tpu.memory_space<smem>>, %arg4: memref<2xi32, #tpu.memory_space<smem>>) -> (i32, i32, i32) {
    %c0_i32 = arith.constant 0 : i32
    %c0_i32_0 = arith.constant 0 : i32
    %c0_i32_1 = arith.constant 0 : i32
    return %arg0, %c0_i32, %c0_i32_0 : i32, i32, i32
  }
  func.func @transform_4(%arg0: i32, %arg1: memref<2xi32, #tpu.memory_space<smem>>, %arg2: memref<2xi32, #tpu.memory_space<smem>>, %arg3: memref<2xi32, #tpu.memory_space<smem>>, %arg4: memref<2xi32, #tpu.memory_space<smem>>) -> (i32, i32, i32) {
    %c0_i32 = arith.constant 0 : i32
    %c0_i32_0 = arith.constant 0 : i32
    %c0_i32_1 = arith.constant 0 : i32
    return %arg0, %c0_i32, %c0_i32_0 : i32, i32, i32
  }
  func.func @transform_5(%arg0: i32, %arg1: memref<2xi32, #tpu.memory_space<smem>>, %arg2: memref<2xi32, #tpu.memory_space<smem>>, %arg3: memref<2xi32, #tpu.memory_space<smem>>, %arg4: memref<2xi32, #tpu.memory_space<smem>>) -> (i32, i32, i32) {
    %c0_i32 = arith.constant 0 : i32
    %c0_i32_0 = arith.constant 0 : i32
    %c0_i32_1 = arith.constant 0 : i32
    return %arg0, %c0_i32, %c0_i32_0 : i32, i32, i32
  }
  func.func @transform_6(%arg0: i32, %arg1: memref<2xi32, #tpu.memory_space<smem>>, %arg2: memref<2xi32, #tpu.memory_space<smem>>, %arg3: memref<2xi32, #tpu.memory_space<smem>>, %arg4: memref<2xi32, #tpu.memory_space<smem>>) -> (i32, i32, i32) {
    %c0_i32 = arith.constant 0 : i32
    %c0_i32_0 = arith.constant 0 : i32
    %c0_i32_1 = arith.constant 0 : i32
    return %arg0, %c0_i32, %c0_i32_0 : i32, i32, i32
  }
  func.func @transform_7(%arg0: i32, %arg1: memref<2xi32, #tpu.memory_space<smem>>, %arg2: memref<2xi32, #tpu.memory_space<smem>>, %arg3: memref<2xi32, #tpu.memory_space<smem>>, %arg4: memref<2xi32, #tpu.memory_space<smem>>) -> (i32, i32, i32) {
    %0 = arith.index_cast %arg0 : i32 to index
    %1 = memref.load %arg2[%0] : memref<2xi32, #tpu.memory_space<smem>>
    %c0_i32 = arith.constant 0 : i32
    %c0_i32_0 = arith.constant 0 : i32
    %c0_i32_1 = arith.constant 0 : i32
    return %1, %c0_i32, %c0_i32_0 : i32, i32, i32
  }
}

</mosaic_0001>

<bundles_post_ra>
// kernel: graphsage_forward.2
= control target key start
LH: loop header
LB: loop body
LE: loop exit
PB: predicated region body
PF: predicated region fallthrough
CT: control target
= control target key end

     0   :  { %s1627_s0 = inlined_call_operand.vmem [shape: s32[2], index: 0, kind: input, shape index: {}]   ;;  %s1628_s4 = inlined_call_operand.vmem [shape: bf16[2,16,16], index: 4, kind: input, shape index: {}]   ;;  %s1629_s5 = inlined_call_operand.vmem [shape: bf16[2,16,128], index: 5, kind: input, shape index: {}, may-alias: {5,6}]   ;;  %s1630_s6 = inlined_call_operand.vmem [shape: bf16[2,16,128], index: 6, kind: input, shape index: {}, may-alias: {5,6}]   ;;  %s1631_s7 = inlined_call_operand.vmem [shape: f32[2,16,1], index: 7, kind: input, shape index: {}]   ;;  %s1632_s8 = inlined_call_operand.hbm [shape: bf16[2,128,128], index: 8, kind: input, shape index: {}]   ;;  %s1633_s9 = inlined_call_operand.hbm [shape: bf16[2,128,128], index: 9, kind: input, shape index: {}]   ;;  %s1634_s10 = inlined_call_operand.vmem [shape: f32[2,1,128], index: 10, kind: input, shape index: {}]   ;;  %s1635_s11 = inlined_call_operand.vmem [shape: bf16[2,16,128], index: 11, kind: output, shape index: {}]   ;;  %s1636_s1 = inlined_call_operand.vmem [shape: s32[2], index: 1, kind: input, shape index: {}]   ;;  %s1637_s2 = inlined_call_operand.vmem [shape: s32[2], index: 2, kind: input, shape index: {}]   ;;  %s1638_s3 = inlined_call_operand.vmem [shape: s32[2], index: 3, kind: input, shape index: {}]  }
   0x1   :  { %1640 = sst [smem:[#allocation16_spill]] %s1628_s4  ;;  %s16_s19 = sshll.u32 %s1627_s0, 4  ;;  %s17_s19 = int_to_ptr.vmem [resolvable:$true] %s16_s19 }
   0x2   :  { %1641 = sst [smem:[#allocation17_spill]] %s1631_s7  ;;  %s20_s22 = sshll.u32 %s1636_s1, 4  ;;  %s21_s22 = int_to_ptr.vmem [resolvable:$true] %s20_s22 }
   0x3   :  { %1642 = sst [smem:[#allocation18_spill]] %s1632_s8  ;;  %s1162_s23 = scalar_lea.vmem %s17_s19, 16 }
   0x4   :  { %1643 = sst [smem:[#allocation19_spill]] %s1633_s9  ;;  %p1163_p0 = scmp.ne.s32.totalorder %s17_s19, %s1162_s23 }
   0x5   :  { %p1167_p1 = scmp.lt.s32.totalorder %s17_s19, %s17_s19  ;;  %p1168_p2 = scmp.lt.s32.totalorder %s1162_s23, %s1162_s23 }
   0x7   :  { %p1169_p3 = por %p1168_p2, %p1167_p1 }
   0x9   :  { %p1170_p4 = pnand %p1169_p3, %p1163_p0 }
   0xb   :  { %1173 = shalt.err (!%p1170_p4)  }
   0xc   :  { %s1312_s24 = smov [#allocation4]   ;;  %s1174_s25 = scalar_lea.vmem %s21_s22, 16 }
   0xd   :  { %19 = dma.vmem_to_smem %s17_s19, 16, %s1312_s24, [#allocation3] }
   0xe   :  { %p1175_p5 = scmp.ne.s32.totalorder %s21_s22, %s1174_s25  ;;  %p1179_p6 = scmp.lt.s32.totalorder %s21_s22, %s21_s22 }
   0xf   :  { %p1180_p7 = scmp.lt.s32.totalorder %s1174_s25, %s1174_s25 }
  0x11   :  { %p1181_p8 = por %p1180_p7, %p1179_p6 }
  0x13   :  { %p1182_p9 = pnand %p1181_p8, %p1175_p5 }
  0x15   :  { %1185 = shalt.err (!%p1182_p9)  }
  0x16   :  { %s1313_s0 = smov [#allocation5]   ;;  %s24_s27 = sshll.u32 %s1637_s2, 4  ;;  %s25_s27 = int_to_ptr.vmem [resolvable:$true] %s24_s27 }
  0x17   :  { %23 = dma.vmem_to_smem %s21_s22, 16, %s1313_s0, [#allocation3] }
  0x18   :  { %s28_s30 = sshll.u32 %s1638_s3, 4  ;;  %s1186_s12 = scalar_lea.vmem %s25_s27, 16  ;;  %s29_s30 = int_to_ptr.vmem [resolvable:$true] %s28_s30 }
  0x19   :  { %p1187_p10 = scmp.ne.s32.totalorder %s25_s27, %s1186_s12  ;;  %p1191_p11 = scmp.lt.s32.totalorder %s25_s27, %s25_s27 }
  0x1a   :  { %p1192_p12 = scmp.lt.s32.totalorder %s1186_s12, %s1186_s12 }
  0x1c   :  { %p1193_p13 = por %p1192_p12, %p1191_p11 }
  0x1e   :  { %p1194_p0 = pnand %p1193_p13, %p1187_p10 }
  0x20   :  { %1197 = shalt.err (!%p1194_p0)  }
  0x21   :  { %s1314_s13 = smov [#allocation6]   ;;  %s1198_s14 = scalar_lea.vmem %s29_s30, 16 }
  0x22   :  { %27 = dma.vmem_to_smem %s25_s27, 16, %s1314_s13, [#allocation3] }
  0x23   :  { %p1199_p1 = scmp.ne.s32.totalorder %s29_s30, %s1198_s14  ;;  %p1203_p2 = scmp.lt.s32.totalorder %s29_s30, %s29_s30 }
  0x24   :  { %p1204_p3 = scmp.lt.s32.totalorder %s1198_s14, %s1198_s14 }
  0x26   :  { %p1205_p4 = por %p1204_p3, %p1203_p2 }
  0x28   :  { %p1206_p5 = pnand %p1205_p4, %p1199_p1 }
  0x2a   :  { %1209 = shalt.err (!%p1206_p5)  }
  0x2b   :  { %s1315_s2 = smov [#allocation7]  }
  0x2c   :  { %31 = dma.vmem_to_smem %s29_s30, 16, %s1315_s2, [#allocation3] }
  0x2d   :  { %1286 = dma.done.wait [#allocation3], 64 }
  0x2e   :  { %1287 = vsyncadd [#allocation3], 4294967232 }
  0x2f   :  { %33 = sfence }
  0x30   :  { %34 = vsyncpa [#allocation9], 0 }
  0x31   :  { %36 = vsyncpa [#allocation9 + $0x1], 0 }
  0x32   :  { %37 = vsyncpa [#allocation11], 0 }
  0x33   :  { %39 = vsyncpa [#allocation11 + $0x1], 0  ;;  %s1396_s3 = smov 0   ;;  %s1398_s15 = smov 0  }
  0x34   :  { %s1400_s16 = smov 0   ;;  %s1402_s17 = smov 0  }
  0x35 LB: > { %s1415_s18 = sadd.s32 4294967295, %s1310_s17   ;;  %s1418_s19 = sadd.s32 1, %s1310_s17   ;;  %s1310_s17 = sphi %s1402_s17, %s1658_s17   ;;  %s1306_s16 = sphi %s1400_s16, %s1657_s16   ;;  %s1302_s15 = sphi %s1398_s15, %s1656_s15   ;;  %s1298_s3 = sphi %s1396_s3, %s1655_s3  }
  0x36   : > { %s157_s20 = ssub.s32 %s1310_s17, %s1418_s19  ;;  %s160_s21 = sadd.s32 1, %s1306_s16 }
  0x37   : > { %p158_p6 = scmp.eq.s32.totalorder %s157_s20, 0  ;;  %p167_p7 = scmp.ne.s32.totalorder %s1306_s16, %s1302_s15 }
  0x38   : > { %p168_p8 = scmp.eq.s32.totalorder %s1310_s17, 0  ;;  %p173_p9 = scmp.ne.s32.totalorder %s1302_s15, %s1298_s3 }
  0x39   : > { %s1428_s22 = scalar_select %p158_p6, %s1306_s16, %s160_s21  }
  0x3a   : > { %p169_p10 = por %p168_p8, %p167_p7  ;;  %p174_p11 = scmp.eq.s32.totalorder %s1415_s18, 0 }
  0x3b   : > { %1644 = sst [smem:[#allocation15_spill]] %s1428_s22  ;;  %p1099_p12 = scmp.lt.s32.totalorder %s1310_s17, 2 }
  0x3c   : > { %p1432_p13 = por %p174_p11, %p173_p9  ;;  %s1437_s24 = sand.u32 1, %s1306_s16  }
  0x3d   : > { %s962_s25 = sshll.u32 %s1437_s24, 6  ;;  %s1008_s0 = sshll.u32 %s1310_s17, 10 }
  0x3e   : > { %s1645_s23 = scalar_select %p1432_p13, 1, 0 }
  0x3f   : > { %s1646_s8 = sld [smem:[#allocation18_spill]]  ;;  %s317_s28 = scalar_lea.vmem [#allocation8], %s962_s25 }
  0x40   : > { %s324_s29 = sshll.u32 %s317_s28, 4  ;;  %p1452_p0 = pnand %p1099_p12, %p169_p10  ;;  %s1450_s29 = int_to_ptr.vmem [resolvable:$true] %s324_s29 }
  0x41   : > { %s314_s12 = scalar_lea.sflag [#allocation9], %s1437_s24 }
  0x42   : > { %p1212_p3 = pneg %p1452_p0 }
  0x45   : > { %s1446_s27 = scalar_lea.hbm %s1646_s8, %s1008_s0  ;;  %s1215_s3 = scalar_lea.hbm %s1646_s8, 2048 }
  0x46   : > { %s1210_s13 = scalar_lea.hbm %s1446_s27, 1024  ;;  %p1216_p6 = scmp.lt.u32.totalorder %s1446_s27, %s1646_s8 }
  0x47   : > { %p1211_p2 = scmp.ne.s32.totalorder %s1446_s27, %s1210_s13  ;;  %p1217_p7 = scmp.lt.u32.totalorder %s1215_s3, %s1210_s13 }
  0x48   : > { %p1219_p9 = scmp.lt.u32.totalorder %s1210_s13, %s1446_s27 }
  0x49   : > { %p1213_p4 = pnand %p1212_p3, %p1211_p2  ;;  %p1218_p8 = por %p1217_p7, %p1216_p6 }
  0x4b   : > { %p1214_p5 = pneg %p1213_p4  ;;  %p1220_p10 = por %p1219_p9, %p1218_p8 }
  0x4d   : > { %p1221_p11 = pnand %p1220_p10, %p1214_p5 }
  0x4f   : > { %1224 = shalt.err (!%p1221_p11)
}
  0x50   : > { %s1225_s1 = scalar_lea.vmem %s1450_s29, 1024  ;;  %s1316_s26 = smov [#allocation8]  }
  0x51   : > { %p1226_p12 = scmp.ne.s32.totalorder %s1450_s29, %s1225_s1  ;;  %s1230_s28 = sshll.u32 %s1316_s26, 4  ;;  %s1231_s28 = int_to_ptr.vmem [resolvable:$false] %s1230_s28 }
  0x52   : > { %s1232_s14 = scalar_lea.vmem %s1231_s28, 2048  ;;  %p1233_p1 = scmp.lt.s32.totalorder %s1450_s29, %s1231_s28 }
  0x53   : > { %p1228_p2 = pnand %p1226_p12, %p1212_p3  ;;  %p1234_p6 = scmp.lt.s32.totalorder %s1232_s14, %s1225_s1 }
  0x55   : > { %p1229_p4 = pneg %p1228_p2  ;;  %p1235_p7 = por %p1234_p6, %p1233_p1 }
  0x57   : > { %p1236_p8 = pnand %p1235_p7, %p1229_p4 }
  0x59   : > { %1239 = shalt.err (!%p1236_p8)
}
  0x5a   : > { %s1317_s13 = smov 64   ;;  %s1318_s2 = smov 4  }
  0x5b   : > { %1095 = dma.hbm_to_vmem [thread:$0]  (!%p1452_p0), %s1446_s27, 1024, %s1450_s29, %s314_s12, %s1317_s13, %s1317_s13, %s1318_s2  }
  0x5c   : > { %p359_p1 = scmp.lt.s32.totalorder %s1310_s17, 3  ;;  %s1648_s9 = sld [smem:[#allocation19_spill]] }
  0x5d   : > { %p1649_p5 = scmp.ge.s32.totalorder %s1310_s17, 1  ;;  %s338_s26 = scalar_lea.vmem [#allocation10], %s962_s25 }
  0x5e   : > { %s345_s28 = sshll.u32 %s338_s26, 4  ;;  %s335_s27 = scalar_lea.sflag [#allocation11], %s1437_s24  ;;  %s1504_s28 = int_to_ptr.vmem [resolvable:$true] %s345_s28 }
  0x5f   : > { %p1498_p9 = pnand %p1649_p5, %p359_p1 }
  0x62   : > { %s1494_s21 = scalar_lea.hbm %s1648_s9, %s1008_s0  ;;  %s1245_s12 = scalar_lea.hbm %s1648_s9, 2048 }
  0x63   : > { %s1240_s29 = scalar_lea.hbm %s1494_s21, 1024  ;;  %p1246_p2 = scmp.lt.u32.totalorder %s1494_s21, %s1648_s9 }
  0x64   : > { %p1241_p10 = scmp.ne.s32.totalorder %s1494_s21, %s1240_s29  ;;  %p1247_p4 = scmp.lt.u32.totalorder %s1245_s12, %s1240_s29 }
  0x65   : > { %p1249_p7 = scmp.lt.u32.totalorder %s1240_s29, %s1494_s21 }
  0x66   : > { %p1243_p11 = pnand %p1241_p10, %p1212_p3  ;;  %p1248_p6 = por %p1247_p4, %p1246_p2 }
  0x68   : > { %p1244_p12 = pneg %p1243_p11  ;;  %p1250_p8 = por %p1249_p7, %p1248_p6 }
  0x6a   : > { %p1251_p1 = pnand %p1250_p8, %p1244_p12 }
  0x6c   : > { %1254 = shalt.err (!%p1251_p1)
}
  0x6d   : > { %s1255_s25 = scalar_lea.vmem %s1504_s28, 1024  ;;  %s1319_s20 = smov [#allocation10]  }
  0x6e   : > { %p1256_p5 = scmp.ne.s32.totalorder %s1504_s28, %s1255_s25  ;;  %s1260_s26 = sshll.u32 %s1319_s20, 4  ;;  %s1261_s26 = int_to_ptr.vmem [resolvable:$false] %s1260_s26 }
  0x6f   : > { %s1262_s17 = scalar_lea.vmem %s1261_s26, 2048  ;;  %p1263_p13 = scmp.lt.s32.totalorder %s1504_s28, %s1261_s26 }
  0x70   : > { %p1258_p10 = pnand %p1256_p5, %p1212_p3  ;;  %p1264_p2 = scmp.lt.s32.totalorder %s1262_s17, %s1255_s25 }
  0x72   : > { %p1259_p11 = pneg %p1258_p10  ;;  %p1265_p4 = por %p1264_p2, %p1263_p13 }
  0x74   : > { %p1266_p6 = pnand %p1265_p4, %p1259_p11 }
  0x76   : > { %1269 = shalt.err (!%p1266_p6)
}
  0x77   : > { %1098 = dma.hbm_to_vmem [thread:$0]  (!%p1452_p0), %s1494_s21, 1024, %s1504_s28, %s335_s27, %s1317_s13, %s1317_s13, %s1318_s2  }
  0x78   : > { %363 = sbr.rel (%p1498_p9) target bundleno = 609 (0x261), region = 48  ;;  %s365_s29 = sand.u32 (!%p1498_p9), 1, %s1302_s15  }
  0x79   : > { %s969_s0 = sshll.u32 (!%p1498_p9), %s365_s29, 6  ;;  %s366_s12 = scalar_lea.sflag (!%p1498_p9), [#allocation9], %s365_s29 }
  0x7a   : > { %s1538_s14 = scalar_lea.vmem (!%p1498_p9), [#allocation8], %s969_s0  ;;  %p1651_p13 = scmp.ne.s32.totalorder (!%p1498_p9), %s1645_s23, 0 }
  0x7f   : > { %1289 = dma.done.wait (%p1651_p13), %s366_s12, 1024  }
  0x80   : > { %1291 = vsyncadd (%p1651_p13), %s366_s12, 4294966272  ;;  %s375_s24 = scalar_lea.sflag [#allocation11], %s365_s29  ;;  %s1544_s30 = scalar_lea.vmem [#allocation10], %s969_s0 }
  0x81   : > { %1293 = dma.done.wait (%p1651_p13), %s375_s24, 1024  }
  0x82   : > { %1295 = vsyncadd (%p1651_p13), %s375_s24, 4294966272  ;;  %p440_p0 = scmp.lt.s32.totalorder %s1415_s18, 1  ;;  %s445_s13 = sld [smem:[#allocation4 + %s1415_s18]] }
  0x83   : > { %s452_s2 = sld [smem:[#allocation5 + %s1415_s18]] }
  0x84   : > { %s467_s21 = sld [smem:[#allocation5 + %s1415_s18]] }
  0x85   : > { %s475_s1 = sld [smem:[#allocation6 + %s1415_s18]] }
  0x86   : > { %s1556_s28 = scalar_select %p440_p0, %s1415_s18, 1 }
  0x87   : > { %s1652_s4 = sld [smem:[#allocation16_spill]]  ;;  %s1653_s7 = sld [smem:[#allocation17_spill]] }
  0x88   : > { %s1010_s27 = sshll.u32 %s1556_s28, 3  ;;  %s1013_s3 = sshll.u32 %s1556_s28, 4 }
  0x89   : > { %p446_p3 = scmp.lt.s32.totalorder %s445_s13, 1  ;;  %p453_p9 = scmp.lt.s32.totalorder %s452_s2, 1 }
  0x8a   : > { %p468_p12 = scmp.lt.s32.totalorder %s467_s21, 1  ;;  %s466_s24 = scalar_lea.vmem %s1634_s10, %s1556_s28 }
  0x8b   : > { %s1660_s13 = smov (!%p446_p3, %s445_s13), 1  ;;  %s1662_s2 = smov (!%p453_p9, %s452_s2), 1 }
  0x8c   : > { %s1011_s8 = sshll.u32 %s1660_s13, 3  ;;  %s1664_s21 = smov (!%p468_p12, %s467_s21), 1 }
  0x8d   : > { %s444_s20 = scalar_lea.vmem %s1652_s4, %s1010_s27  ;;  %s1566_s29 = scalar_lea.vmem %s1653_s7, %s1013_s3 }
  0x8e   : > { %s450_s23 = scalar_lea.vmem %s1629_s5, %s1011_s8  ;;  %s1012_s27 = sshll.u32 %s1662_s2, 3 }
  0x8f   : > { %s1578_s3 = scalar_lea.vmem %s1630_s6, %s1012_s27  ;;  %s1014_s26 = sshll.u32 %s1664_s21, 3 }
  0x90   : > { %s1583_s0 = scalar_lea.vmem %s1635_s11, %s1014_s26  ;;  %p981_p7 = scmp.ne.s32.totalorder %s475_s1, 1 }
  0x91   : > { %v1320_v0 = vmov (!%p981_p7), 0.0  }
  0x92   : > { %479 = sbr.rel (%p981_p7) target bundleno = 153 (0x99), region = 60  ;;  %480 = vst [vmem:[#allocation2] sm:$0xff] (!%p981_p7), %v1320_v0  ;;  %481 = vst [vmem:[#allocation2 + $0x8] sm:$0xff] (!%p981_p7), %v1320_v0 }
  0x99 PF: > { %v1143_v1 = vld [vmem:[%s450_s23] sm:$0xff]   ;;  %v1321_v2 = vmov 0.0   ;;  %vm1322_vm0 = vmmov 0   ;;  %vm533_vm1 = vcmask 130048   ;;  %v1323_v5 = vmov 0   ;;  %v521_v6 = vld [vmem:[%s1566_s29 + $0x8] sm:$0xff] }
  0x9a   : > { %1042 = vmatprep.subr.bf16.mxu0 %v1321_v2  ;;  %v1144_v3 = vld [vmem:[%s444_s20] sm:$0xff]   ;;  %1048 = vmatprep.subr.bf16.mxu1 %v1321_v2  ;;  %v1145_v7 = vld [vmem:[%s1544_s30] sm:$0xff]   ;;  %v1147_v9 = vld [vmem:[%s1544_s30 + $0x8] sm:$0xff]   ;;  %s790_s4 = sld [smem:[#allocation7 + %s1415_s18]] }
  0x9b   : > { %1043 = vmatpush3.bf16.msra.mxu0 %v1143_v1  ;;  %1044 = vmatprep.mubr.msk.bf16.mxu0 %vm1322_vm0, %v1321_v2  ;;  %v520_v4 = vld [vmem:[%s1566_s29] sm:$0xff]  ;;  %v1146_v8 = vld [vmem:[%s1538_s14] sm:$0xff]   ;;  %v1148_v10 = vld [vmem:[%s1538_s14 + $0x8] sm:$0xff]  }
  0x9c   : > { %1142 = vset.pattern.permute.xlu0 %v1323_v5  ;;  %1068 = vmatprep.subr.bf16.mxu0 %v1321_v2  ;;  %v1149_v11 = vld [vmem:[%s1544_s30 + $0x10] sm:$0xff]   ;;  %v1151_v13 = vld [vmem:[%s1544_s30 + $0x18] sm:$0xff]   ;;  %v1153_v15 = vld [vmem:[%s1544_s30 + $0x20] sm:$0xff]  }
  0x9d   : > { %580 = vperm.xlu0 %1142, %v520_v4   ;;  %1064 = vmatprep.mubr.msk.bf16.mxu1 %vm1322_vm0, %v1321_v2  ;;  %v1150_v12 = vld [vmem:[%s1538_s14 + $0x10] sm:$0xff]   ;;  %v1152_v14 = vld [vmem:[%s1538_s14 + $0x18] sm:$0xff]   ;;  %v1154_v16 = vld [vmem:[%s1538_s14 + $0x20] sm:$0xff]  }
  0x9e   : > { %1045 = vmatmul.mubr.msk.bf16.vlgmr.msra.gmra.mrb[0].mxu0 %vm533_vm1, %v1144_v3  ;;  %1049 = vmatpush3.bf16.msra.mxu1 %v1145_v7  ;;  %v1155_v17 = vld [vmem:[%s1544_s30 + $0x28] sm:$0xff]   ;;  %v1157_v19 = vld [vmem:[%s1544_s30 + $0x30] sm:$0xff]   ;;  %v1159_v21 = vld [vmem:[%s1544_s30 + $0x38] sm:$0xff]  }
  0x9f   : > { %1050 = vmatprep.subr.bf16.mxu1 %v1321_v2  ;;  %1069 = vmatpush3.bf16.msra.mxu0 %v1146_v8  ;;  %v1156_v18 = vld [vmem:[%s1538_s14 + $0x28] sm:$0xff]   ;;  %v1158_v20 = vld [vmem:[%s1538_s14 + $0x30] sm:$0xff]   ;;  %v1161_v23 = vld [vmem:[%s1538_s14 + $0x38] sm:$0xff]  }
  0xa0   : > { %1070 = vmatprep.subr.bf16.mxu0 %v1321_v2  ;;  %1084 = vmatprep.mubr.msk.bf16.mxu0 %vm1322_vm0, %v1321_v2  ;;  %v1160_v22 = vld [vmem:[%s1578_s3] sm:$0xff]   ;;  %v785_v46 = vld [vmem:[#allocation2 + $0x8] sm:$0xff]  ;;  %p1003_p8 = scmp.ne.s32.totalorder %s790_s4, 1 }
  0xa1   : > { %585 = vperm.xlu0 %1142, %v521_v6   ;;  %v1002_v38 = vld [vmem:[%s466_s24] ss:$0 sm:$0xff] }
  0xa2   : > { %1051 = vmatpush3.bf16.msra.mxu1 %v1147_v9  ;;  %v784_v41 = vld [vmem:[#allocation2] sm:$0xff] }
  0xa3   : > { %1052 = vmatprep.subr.bf16.mxu1 %v1321_v2  ;;  %1071 = vmatpush3.bf16.msra.mxu0 %v1148_v10 }
  0xa4   : > { %1072 = vmatprep.subr.bf16.mxu0 %v1321_v2 }
  0xa6   : > { %1053 = vmatpush3.bf16.msra.mxu1 %v1149_v11 }
  0xa7   : > { %1054 = vmatprep.subr.bf16.mxu1 %v1321_v2  ;;  %1073 = vmatpush3.bf16.msra.mxu0 %v1150_v12 }
  0xa8   : > { %1074 = vmatprep.subr.bf16.mxu0 %v1321_v2 }
  0xaa   : > { %1055 = vmatpush3.bf16.msra.mxu1 %v1151_v13 }
  0xab   : > { %1056 = vmatprep.subr.bf16.mxu1 %v1321_v2  ;;  %1075 = vmatpush3.bf16.msra.mxu0 %v1152_v14 }
  0xac   : > { %1076 = vmatprep.subr.bf16.mxu0 %v1321_v2 }
  0xae   : > { %1057 = vmatpush3.bf16.msra.mxu1 %v1153_v15 }
  0xaf   : > { %1058 = vmatprep.subr.bf16.mxu1 %v1321_v2  ;;  %1077 = vmatpush3.bf16.msra.mxu0 %v1154_v16 }
  0xb0   : > { %1078 = vmatprep.subr.bf16.mxu0 %v1321_v2 }
  0xb2   : > { %1059 = vmatpush3.bf16.msra.mxu1 %v1155_v17 }
  0xb3   : > { %1060 = vmatprep.subr.bf16.mxu1 %v1321_v2  ;;  %1079 = vmatpush3.bf16.msra.mxu0 %v1156_v18 }
  0xb4   : > { %1080 = vmatprep.subr.bf16.mxu0 %v1321_v2 }
  0xb6   : > { %1061 = vmatpush3.bf16.msra.mxu1 %v1157_v19 }
  0xb7   : > { %1062 = vmatprep.subr.bf16.mxu1 %v1321_v2  ;;  %1081 = vmatpush3.bf16.msra.mxu0 %v1158_v20 }
  0xb8   : > { %1082 = vmatprep.subr.bf16.mxu0 %v1321_v2 }
  0xba   : > { %1063 = vmatpush3.bf16.msra.mxu1 %v1159_v21 }
  0xbb   : > { %1083 = vmatpush3.bf16.msra.mxu0 %v1161_v23 }
  0xbd   : > { %1065 = vmatmul.mubr.bf16.vlgmr.msra.gmra.mrb[0].mxu1 %v1160_v22 }
 0x11c   : > { %v581_v24 = vpop.permute.xlu0 %580 }
 0x120   : > { %v586_v27 = vpop.permute.xlu0 %585 }
 0x171   : > { %v571_v25 = vpop.f32.mrb[0].mxu0 }
 0x172   : > { %v1046_v26 = vpop.f32.mrb[1].mxu0  ;;  %v588_v29 = vmul.f32 %v581_v24, %v571_v25 }
 0x173   : > { %v574_v28 = vpop.f32.mrb[2].mxu0 }
 0x174   : > { %v589_v30 = vmul.f32 %v586_v27, %v574_v28  ;;  %v1047_v31 = vpop.f32.mrb[3].mxu0 }
 0x176   : > { %v590_v32 = vpack.c.bf16 %v589_v30, %v588_v29 }
 0x178   : > { %1085 = vmatmul.mubr.bf16.vlgmr.msra.gmra.mrb[4].mxu0 %v590_v32 }
 0x190   : > { %v679_v33 = vpop.f32.mrb[0].mxu1 }
 0x191   : > { %v1066_v34 = vpop.f32.mrb[1].mxu1 }
 0x192   : > { %v682_v35 = vpop.f32.mrb[2].mxu1 }
 0x193   : > { %v1067_v36 = vpop.f32.mrb[3].mxu1 }
 0x24b   : > { %v768_v37 = vpop.f32.mrb[4].mxu0 }
 0x24c   : > { %v769_v39 = vadd.f32 %v768_v37, %v679_v33  ;;  %v1086_v40 = vpop.f32.mrb[5].mxu0 }
 0x24d   : > { %v771_v42 = vpop.f32.mrb[6].mxu0 }
 0x24e   : > { %v782_v43 = vadd.f32 %v1002_v38, %v769_v39  ;;  %v772_v44 = vadd.f32 %v771_v42, %v682_v35  ;;  %v1087_v45 = vpop.f32.mrb[7].mxu0  ;;  %794 = sbr.rel (%p1003_p8) target bundleno = 609 (0x261), region = 64 }
 0x250   : > { %v786_v47 = vadd.f32 %v784_v41, %v782_v43  ;;  %v783_v48 = vadd.f32 %v1002_v38, %v772_v44 }
 0x252   : > { %788 = vst [vmem:[#allocation2] sm:$0xff] %v786_v47  ;;  %v787_v49 = vadd.f32 %v785_v46, %v783_v48 }
 0x254   : > { %789 = vst [vmem:[#allocation2 + $0x8] sm:$0xff] %v787_v49 }
 0x259   : > { %v795_v50 = vld [vmem:[#allocation2] sm:$0xff] }
 0x25a   : > { %v797_v52 = vmax.f32 %v795_v50, 0.0 }
 0x25b   : > { %v796_v51 = vld [vmem:[#allocation2 + $0x8] sm:$0xff] }
 0x25c   : > { %v798_v53 = vmax.f32 %v796_v51, 0.0 }
 0x25e   : > { %v1020_v54 = vpack.c.bf16 %v798_v53, %v797_v52 }
 0x260   : > { %1021 = vst [vmem:[%s1583_s0] sm:$0xff] %v1020_v54  }
 0x261 PF: > { %s1654_s9 = sld [smem:[#allocation15_spill]]  ;;  %p42_p1 = scmp.ge.s32.totalorder %s1418_s19, 4  }
 0x262   : > { %s1655_s3 = smov %s1302_s15  ;;  %s1656_s15 = smov %s1306_s16 }
 0x263   : > { %s1658_s17 = smov %s1418_s19  ;;  %44 = sbr.rel (!%p42_p1) target bundleno = 53 (0x35), region = 124 }
 0x267   : > { %s1657_s16 = smov %s1654_s9 }
 0x26a   :  { %833 = vsyncpa [#allocation9], 1 }
 0x26b   :  { %835 = vsyncpa [#allocation9 + $0x1], 1 }
 0x26c   :  { %836 = vsyncpa [#allocation11], 1 }
 0x26d   :  { %838 = vsyncpa [#allocation11 + $0x1], 1 }

// kernel: graphsage_forward.3
= control target key start
LH: loop header
LB: loop body
LE: loop exit
PB: predicated region body
PF: predicated region fallthrough
CT: control target
= control target key end

     0   :  { %s1494_s0 = inlined_call_operand.vmem [shape: s32[2], index: 0, kind: input, shape index: {}]   ;;  %s1495_s4 = inlined_call_operand.vmem [shape: bf16[2,16,16], index: 4, kind: input, shape index: {}]   ;;  %s1496_s5 = inlined_call_operand.vmem [shape: bf16[2,16,128], index: 5, kind: input, shape index: {}, may-alias: {5,6}]   ;;  %s1497_s6 = inlined_call_operand.vmem [shape: bf16[2,16,128], index: 6, kind: input, shape index: {}, may-alias: {5,6}]   ;;  %s1498_s7 = inlined_call_operand.vmem [shape: f32[2,16,1], index: 7, kind: input, shape index: {}]   ;;  %s1499_s8 = inlined_call_operand.vmem [shape: bf16[2,128,128], index: 8, kind: input, shape index: {}]   ;;  %s1500_s9 = inlined_call_operand.vmem [shape: bf16[2,128,128], index: 9, kind: input, shape index: {}]   ;;  %s1501_s10 = inlined_call_operand.vmem [shape: f32[2,1,128], index: 10, kind: input, shape index: {}]   ;;  %s1502_s11 = inlined_call_operand.hbm [shape: f32[2,16,128], index: 11, kind: output, shape index: {}]   ;;  %s1503_s1 = inlined_call_operand.vmem [shape: s32[2], index: 1, kind: input, shape index: {}]   ;;  %s1504_s2 = inlined_call_operand.vmem [shape: s32[2], index: 2, kind: input, shape index: {}]   ;;  %s1505_s3 = inlined_call_operand.vmem [shape: s32[2], index: 3, kind: input, shape index: {}]  }
   0x1   :  { %1513 = sst [smem:[#allocation19_spill]] %s1495_s4  ;;  %s16_s19 = sshll.u32 %s1494_s0, 4  ;;  %s17_s19 = int_to_ptr.vmem [resolvable:$true] %s16_s19 }
   0x2   :  { %1514 = sst [smem:[#allocation20_spill]] %s1498_s7  ;;  %s20_s22 = sshll.u32 %s1503_s1, 4  ;;  %s21_s22 = int_to_ptr.vmem [resolvable:$true] %s20_s22 }
   0x3   :  { %1515 = sst [smem:[#allocation21_spill]] %s1499_s8  ;;  %s1092_s23 = scalar_lea.vmem %s17_s19, 16 }
   0x4   :  { %p1093_p0 = scmp.ne.s32.totalorder %s17_s19, %s1092_s23  ;;  %p1097_p1 = scmp.lt.s32.totalorder %s17_s19, %s17_s19 }
   0x5   :  { %p1098_p2 = scmp.lt.s32.totalorder %s1092_s23, %s1092_s23 }
   0x7   :  { %p1099_p3 = por %p1098_p2, %p1097_p1 }
   0x9   :  { %p1100_p4 = pnand %p1099_p3, %p1093_p0 }
   0xb   :  { %1103 = shalt.err (!%p1100_p4)  }
   0xc   :  { %s1206_s24 = smov [#allocation4]   ;;  %s1104_s25 = scalar_lea.vmem %s21_s22, 16 }
   0xd   :  { %19 = dma.vmem_to_smem %s17_s19, 16, %s1206_s24, [#allocation3] }
   0xe   :  { %p1105_p5 = scmp.ne.s32.totalorder %s21_s22, %s1104_s25  ;;  %p1109_p6 = scmp.lt.s32.totalorder %s21_s22, %s21_s22 }
   0xf   :  { %p1110_p7 = scmp.lt.s32.totalorder %s1104_s25, %s1104_s25 }
  0x11   :  { %p1111_p8 = por %p1110_p7, %p1109_p6 }
  0x13   :  { %p1112_p9 = pnand %p1111_p8, %p1105_p5 }
  0x15   :  { %1115 = shalt.err (!%p1112_p9)  }
  0x16   :  { %s1207_s0 = smov [#allocation5]   ;;  %s24_s27 = sshll.u32 %s1504_s2, 4  ;;  %s25_s27 = int_to_ptr.vmem [resolvable:$true] %s24_s27 }
  0x17   :  { %23 = dma.vmem_to_smem %s21_s22, 16, %s1207_s0, [#allocation3] }
  0x18   :  { %s28_s30 = sshll.u32 %s1505_s3, 4  ;;  %s1116_s12 = scalar_lea.vmem %s25_s27, 16  ;;  %s29_s30 = int_to_ptr.vmem [resolvable:$true] %s28_s30 }
  0x19   :  { %p1117_p10 = scmp.ne.s32.totalorder %s25_s27, %s1116_s12  ;;  %p1121_p11 = scmp.lt.s32.totalorder %s25_s27, %s25_s27 }
  0x1a   :  { %p1122_p12 = scmp.lt.s32.totalorder %s1116_s12, %s1116_s12 }
  0x1c   :  { %p1123_p13 = por %p1122_p12, %p1121_p11 }
  0x1e   :  { %p1124_p0 = pnand %p1123_p13, %p1117_p10 }
  0x20   :  { %1127 = shalt.err (!%p1124_p0)  }
  0x21   :  { %s1208_s13 = smov [#allocation6]   ;;  %s1128_s14 = scalar_lea.vmem %s29_s30, 16 }
  0x22   :  { %27 = dma.vmem_to_smem %s25_s27, 16, %s1208_s13, [#allocation3] }
  0x23   :  { %p1129_p1 = scmp.ne.s32.totalorder %s29_s30, %s1128_s14  ;;  %p1133_p2 = scmp.lt.s32.totalorder %s29_s30, %s29_s30 }
  0x24   :  { %p1134_p3 = scmp.lt.s32.totalorder %s1128_s14, %s1128_s14 }
  0x26   :  { %p1135_p4 = por %p1134_p3, %p1133_p2 }
  0x28   :  { %p1136_p5 = pnand %p1135_p4, %p1129_p1 }
  0x2a   :  { %1139 = shalt.err (!%p1136_p5)  }
  0x2b   :  { %s1209_s2 = smov [#allocation7]  }
  0x2c   :  { %31 = dma.vmem_to_smem %s29_s30, 16, %s1209_s2, [#allocation3] }
  0x2d   :  { %1184 = dma.done.wait [#allocation3], 64 }
  0x2e   :  { %1185 = vsyncadd [#allocation3], 4294967232 }
  0x2f   :  { %33 = sfence }
  0x30   :  { %34 = vsyncpa [#allocation9], 0 }
  0x31   :  { %36 = vsyncpa [#allocation9 + $0x1], 0  ;;  %s1289_s3 = smov 0   ;;  %s1291_s15 = smov 0  }
  0x32   :  { %s1293_s16 = smov 0   ;;  %s1295_s17 = smov 0  }
  0x33 LB: > { %1516 = sst [smem:[#allocation13_spill]] %s1192_s3  ;;  %s1310_s18 = sadd.s32 4294967295, %s1204_s17   ;;  %s1204_s17 = sphi %s1295_s17, %s1531_s17   ;;  %s1200_s16 = sphi %s1293_s16, %s1533_s16   ;;  %s1196_s15 = sphi %s1291_s15, %s1535_s15   ;;  %s1192_s3 = sphi %s1289_s3, %s1534_s3  }
  0x34   : > { %1517 = sst [smem:[#allocation14_spill]] %s1200_s16  ;;  %s903_s19 = sadd.s32 4294967294, %s1204_s17  }
  0x35   : > { %1518 = sst [smem:[#allocation15_spill]] %s1204_s17  ;;  %s1314_s20 = sadd.s32 1, %s1204_s17  }
  0x36   : > { %1519 = sst [smem:[#allocation16_spill]] %s1314_s20  ;;  %p247_p6 = scmp.ne.s32.totalorder %s1200_s16, %s1196_s15 }
  0x37   : > { %s232_s21 = sld [smem:[#allocation5 + %s1204_s17]]  ;;  %p248_p7 = scmp.eq.s32.totalorder %s1310_s18, 1 }
  0x38   : > { %s233_s22 = sld [smem:[#allocation5 + %s1314_s20]]  ;;  %p253_p8 = scmp.ne.s32.totalorder %s1196_s15, %s1192_s3 }
  0x39   : > { %p254_p9 = scmp.eq.s32.totalorder %s903_s19, 1  ;;  %p1323_p10 = por %p248_p7, %p247_p6 }
  0x3a   : > { %p906_p11 = scmp.ge.s32.totalorder %s1204_s17, 1  ;;  %p330_p13 = scmp.lt.s32.totalorder %s1204_s17, 3 }
  0x3b   : > { %p1328_p12 = por %p254_p9, %p253_p8  ;;  %s237_s25 = sadd.s32 1, %s1200_s16 }
  0x3c   : > { %p331_p0 = pnand %p906_p11, %p330_p13 }
  0x3d   : > { %s1521_s24 = scalar_select %p1328_p12, 1, 0 }
  0x3e   : > { %s234_s0 = ssub.s32 %s232_s21, %s233_s22  ;;  %334 = sbr.rel (%p331_p0) target bundleno = 628 (0x274), region = 48 }
  0x3f   : > { %1522 = sst [smem:[#allocation17_spill]] %s1521_s24  ;;  %p235_p1 = scmp.eq.s32.totalorder %s234_s0, 0 }
  0x40   : > { %s1506_s26 = sand.u32 (!%p331_p0), 1, %s1196_s15   ;;  %p392_p2 = scmp.lt.s32.totalorder (!%p331_p0), %s1310_s18, 1 }
  0x41   : > { %s1335_s1 = scalar_select %p235_p1, %s1200_s16, %s237_s25  }
  0x42   : > { %s907_s27 = sshll.u32 (!%p331_p0), %s1506_s26, 4  ;;  %s397_s28 = sld [smem:[#allocation4 + %s1310_s18]] (!%p331_p0) }
  0x43   : > { %1523 = sst [smem:[#allocation18_spill]] %s1335_s1  ;;  %s1524_s4 = sld [smem:[#allocation19_spill]] (!%p331_p0) }
  0x44   : > { %s404_s29 = sld [smem:[#allocation5 + %s1310_s18]] (!%p331_p0)  ;;  %s1384_s17 = scalar_lea.vmem (!%p331_p0), [#allocation8], %s907_s27 }
  0x45   : > { %s1344_s30 = scalar_select %p392_p2, %s1310_s18, 1 }
  0x46   : > { %s431_s12 = sld [smem:[#allocation6 + %s1310_s18]] }
  0x47   : > { %s948_s13 = sshll.u32 %s1344_s30, 3  ;;  %s951_s14 = sshll.u32 %s1344_s30, 4 }
  0x48   : > { %s1525_s7 = sld [smem:[#allocation20_spill]]  ;;  %p398_p3 = scmp.lt.s32.totalorder %s397_s28, 1 }
  0x49   : > { %s1352_s21 = scalar_lea.vmem %s1524_s4, %s948_s13  ;;  %s952_s26 = sshll.u32 %s1344_s30, 6 }
  0x4a   : > { %p405_p4 = scmp.lt.s32.totalorder %s404_s29, 1  ;;  %s1526_s8 = sld [smem:[#allocation21_spill]] }
  0x4b   : > { %s1537_s28 = smov (!%p398_p3, %s397_s28), 1  ;;  %s1368_s13 = scalar_lea.vmem %s1500_s9, %s952_s26 }
  0x4c   : > { %s1539_s29 = smov (!%p405_p4, %s404_s29), 1  ;;  %s949_s24 = sshll.u32 %s1537_s28, 3 }
  0x4d   : > { %s950_s25 = sshll.u32 %s1539_s29, 3  ;;  %s428_s28 = scalar_lea.vmem %s1501_s10, %s1344_s30 }
  0x4e   : > { %s1357_s0 = scalar_lea.vmem %s1525_s7, %s951_s14  ;;  %s1373_s14 = scalar_lea.vmem %s1496_s5, %s949_s24 }
  0x4f   : > { %s1378_s16 = scalar_lea.vmem %s1497_s6, %s950_s25  ;;  %p920_p5 = scmp.ne.s32.totalorder %s431_s12, 1 }
  0x50   : > { %s1363_s20 = scalar_lea.vmem %s1526_s8, %s952_s26  ;;  %v1210_v0 = vmov (!%p920_p5), 0.0  }
  0x51   : > { %435 = sbr.rel (%p920_p5) target bundleno = 88 (0x58), region = 52  ;;  %436 = vst [vmem:[#allocation2] sm:$0xff] (!%p920_p5), %v1210_v0  ;;  %437 = vst [vmem:[#allocation2 + $0x8] sm:$0xff] (!%p920_p5), %v1210_v0 }
  0x58 PF: > { %v1073_v1 = vld [vmem:[%s1363_s20] sm:$0xff]   ;;  %v1211_v2 = vmov 0.0   ;;  %v1074_v3 = vld [vmem:[%s1363_s20 + $0x8] sm:$0xff]   ;;  %vm1212_vm0 = vmmov 0   ;;  %v1075_v4 = vld [vmem:[%s1363_s20 + $0x10] sm:$0xff]   ;;  %v1213_v12 = vmov 0  }
  0x59   : > { %975 = vmatprep.subr.bf16.mxu0 %v1211_v2  ;;  %995 = vmatprep.subr.bf16.mxu1 %v1211_v2  ;;  %v1076_v5 = vld [vmem:[%s1363_s20 + $0x18] sm:$0xff]   ;;  %v1077_v6 = vld [vmem:[%s1363_s20 + $0x20] sm:$0xff]   ;;  %v1078_v7 = vld [vmem:[%s1363_s20 + $0x28] sm:$0xff]   ;;  %vm579_vm1 = vcmask 130048   ;;  %s748_s4 = sld [smem:[#allocation7 + %s1310_s18]] }
  0x5a   : > { %976 = vmatpush3.bf16.msra.mxu0 %v1073_v1  ;;  %991 = vmatprep.mubr.msk.bf16.mxu0 %vm1212_vm0, %v1211_v2  ;;  %v1079_v8 = vld [vmem:[%s1363_s20 + $0x30] sm:$0xff]   ;;  %v1080_v9 = vld [vmem:[%s1363_s20 + $0x38] sm:$0xff]   ;;  %v1081_v10 = vld [vmem:[%s1373_s14] sm:$0xff]  }
  0x5b   : > { %977 = vmatprep.subr.bf16.mxu0 %v1211_v2  ;;  %997 = vmatprep.mubr.msk.bf16.mxu1 %vm1212_vm0, %v1211_v2  ;;  %v476_v11 = vld [vmem:[%s1357_s0] sm:$0xff]  ;;  %v477_v13 = vld [vmem:[%s1357_s0 + $0x8] sm:$0xff]  ;;  %v1085_v22 = vld [vmem:[%s1368_s13 + $0x10] sm:$0xff]  }
  0x5c   : > { %1072 = vset.pattern.permute.xlu0 %v1213_v12  ;;  %v1082_v19 = vld [vmem:[%s1352_s21] sm:$0xff]   ;;  %v1084_v21 = vld [vmem:[%s1368_s13 + $0x8] sm:$0xff]   ;;  %v1086_v23 = vld [vmem:[%s1368_s13 + $0x18] sm:$0xff]  }
  0x5d   : > { %626 = vperm.xlu0 %1072, %v476_v11   ;;  %v1083_v20 = vld [vmem:[%s1368_s13] sm:$0xff]   ;;  %v1088_v25 = vld [vmem:[%s1368_s13 + $0x28] sm:$0xff]   ;;  %v1089_v26 = vld [vmem:[%s1368_s13 + $0x30] sm:$0xff]  }
  0x5e   : > { %978 = vmatpush3.bf16.msra.mxu0 %v1074_v3  ;;  %v1087_v24 = vld [vmem:[%s1368_s13 + $0x20] sm:$0xff]   ;;  %v1090_v27 = vld [vmem:[%s1368_s13 + $0x38] sm:$0xff]   ;;  %v743_v46 = vld [vmem:[#allocation2 + $0x8] sm:$0xff] }
  0x5f   : > { %979 = vmatprep.subr.bf16.mxu0 %v1211_v2  ;;  %v1091_v28 = vld [vmem:[%s1378_s16] sm:$0xff]   ;;  %p942_p6 = scmp.ne.s32.totalorder %s748_s4, 1 }
  0x60   : > { %v941_v37 = vld [vmem:[%s428_s28] ss:$0 sm:$0xff] }
  0x61   : > { %631 = vperm.xlu0 %1072, %v477_v13   ;;  %v742_v41 = vld [vmem:[#allocation2] sm:$0xff] }
  0x62   : > { %980 = vmatpush3.bf16.msra.mxu0 %v1075_v4 }
  0x63   : > { %981 = vmatprep.subr.bf16.mxu0 %v1211_v2 }
  0x66   : > { %982 = vmatpush3.bf16.msra.mxu0 %v1076_v5 }
  0x67   : > { %983 = vmatprep.subr.bf16.mxu0 %v1211_v2 }
  0x6a   : > { %984 = vmatpush3.bf16.msra.mxu0 %v1077_v6 }
  0x6b   : > { %985 = vmatprep.subr.bf16.mxu0 %v1211_v2 }
  0x6e   : > { %986 = vmatpush3.bf16.msra.mxu0 %v1078_v7 }
  0x6f   : > { %987 = vmatprep.subr.bf16.mxu0 %v1211_v2 }
  0x72   : > { %988 = vmatpush3.bf16.msra.mxu0 %v1079_v8 }
  0x73   : > { %989 = vmatprep.subr.bf16.mxu0 %v1211_v2 }
  0x76   : > { %990 = vmatpush3.bf16.msra.mxu0 %v1080_v9 }
  0x79   : > { %992 = vmatmul.mubr.bf16.vlgmr.msra.gmra.mrb[0].mxu0 %v1081_v10 }
  0xdc   : > { %v627_v33 = vpop.permute.xlu0 %626 }
  0xe0   : > { %v632_v34 = vpop.permute.xlu0 %631 }
 0x14c   : > { %v566_v14 = vpop.f32.mrb[0].mxu0 }
 0x14d   : > { %v993_v15 = vpop.f32.mrb[1].mxu0 }
 0x14e   : > { %v569_v16 = vpop.f32.mrb[2].mxu0 }
 0x14f   : > { %v573_v17 = vpack.c.bf16 %v569_v16, %v566_v14  ;;  %v994_v18 = vpop.f32.mrb[3].mxu0 }
 0x151   : > { %996 = vmatpush3.bf16.msra.mxu1 %v573_v17 }
 0x152   : > { %1001 = vmatprep.subr.bf16.mxu1 %v1211_v2 }
 0x154   : > { %998 = vmatmul.mubr.msk.bf16.vlgmr.msra.gmra.mrb[0].mxu1 %vm579_vm1, %v1082_v19 }
 0x155   : > { %1002 = vmatpush3.bf16.msra.mxu1 %v1083_v20  ;;  %1017 = vmatprep.mubr.msk.bf16.mxu1 %vm1212_vm0, %v1211_v2 }
 0x156   : > { %1003 = vmatprep.subr.bf16.mxu1 %v1211_v2 }
 0x159   : > { %1004 = vmatpush3.bf16.msra.mxu1 %v1084_v21 }
 0x15a   : > { %1005 = vmatprep.subr.bf16.mxu1 %v1211_v2 }
 0x15d   : > { %1006 = vmatpush3.bf16.msra.mxu1 %v1085_v22 }
 0x15e   : > { %1007 = vmatprep.subr.bf16.mxu1 %v1211_v2 }
 0x161   : > { %1008 = vmatpush3.bf16.msra.mxu1 %v1086_v23 }
 0x162   : > { %1009 = vmatprep.subr.bf16.mxu1 %v1211_v2 }
 0x165   : > { %1010 = vmatpush3.bf16.msra.mxu1 %v1087_v24 }
 0x166   : > { %1011 = vmatprep.subr.bf16.mxu1 %v1211_v2 }
 0x169   : > { %1012 = vmatpush3.bf16.msra.mxu1 %v1088_v25 }
 0x16a   : > { %1013 = vmatprep.subr.bf16.mxu1 %v1211_v2 }
 0x16d   : > { %1014 = vmatpush3.bf16.msra.mxu1 %v1089_v26 }
 0x16e   : > { %1015 = vmatprep.subr.bf16.mxu1 %v1211_v2 }
 0x171   : > { %1016 = vmatpush3.bf16.msra.mxu1 %v1090_v27 }
 0x174   : > { %1018 = vmatmul.mubr.bf16.vlgmr.msra.gmra.mrb[4].mxu1 %v1091_v28 }
 0x227   : > { %v617_v29 = vpop.f32.mrb[0].mxu1 }
 0x228   : > { %v999_v30 = vpop.f32.mrb[1].mxu1  ;;  %v634_v35 = vmul.f32 %v627_v33, %v617_v29 }
 0x229   : > { %v620_v31 = vpop.f32.mrb[2].mxu1 }
 0x22a   : > { %v1000_v32 = vpop.f32.mrb[3].mxu1  ;;  %v635_v38 = vmul.f32 %v632_v34, %v620_v31 }
 0x247   : > { %v724_v36 = vpop.f32.mrb[4].mxu1 }
 0x248   : > { %v731_v39 = vadd.f32 %v724_v36, %v634_v35  ;;  %v1019_v40 = vpop.f32.mrb[5].mxu1 }
 0x249   : > { %v727_v42 = vpop.f32.mrb[6].mxu1 }
 0x24a   : > { %v740_v43 = vadd.f32 %v941_v37, %v731_v39  ;;  %v732_v44 = vadd.f32 %v727_v42, %v635_v38  ;;  %v1020_v45 = vpop.f32.mrb[7].mxu1  ;;  %752 = sbr.rel (%p942_p6) target bundleno = 601 (0x259), region = 56 }
 0x24c   : > { %v744_v47 = vadd.f32 %v742_v41, %v740_v43  ;;  %v741_v48 = vadd.f32 %v941_v37, %v732_v44 }
 0x24e   : > { %746 = vst [vmem:[#allocation2] sm:$0xff] %v744_v47  ;;  %v745_v49 = vadd.f32 %v743_v46, %v741_v48 }
 0x250   : > { %747 = vst [vmem:[#allocation2 + $0x8] sm:$0xff] %v745_v49 }
 0x255   : > { %v753_v50 = vld [vmem:[#allocation2] sm:$0xff] }
 0x256   : > { %755 = vst [vmem:[%s1384_s17] sm:$0xff] %v753_v50 }
 0x257   : > { %v754_v51 = vld [vmem:[#allocation2 + $0x8] sm:$0xff] }
 0x258   : > { %756 = vst [vmem:[%s1384_s17 + $0x8] sm:$0xff] %v754_v51 }
 0x259 PF: > { %s1021_s3 = scalar_select %p1323_p10, [#allocation5], [#allocation10] }
 0x25a   : > { %s1541_s18 = smov (!%p1323_p10, %s1310_s18), 0  ;;  %s772_s24 = sshll.u32 %s1384_s17, 4  ;;  %s1444_s24 = int_to_ptr.vmem [resolvable:$true] %s772_s24 }
 0x25b   : > { %s765_s20 = sld [smem:[%s1021_s3 + %s1541_s18]]  ;;  %s1527_s12 = sand.u32 1, %s1196_s15  }
 0x25c   : > { %s1453_s21 = scalar_lea.sflag [#allocation9], %s1527_s12  ;;  %s1140_s0 = scalar_lea.vmem %s1444_s24, 256 }
 0x25d   : > { %p1141_p7 = scmp.ne.s32.totalorder %s1444_s24, %s1140_s0  ;;  %s1214_s17 = smov [#allocation8]  }
 0x25e   : > { %s1144_s18 = sshll.u32 %s1214_s17, 4  ;;  %s1145_s18 = int_to_ptr.vmem [resolvable:$false] %s1144_s18 }
 0x25f   : > { %p1142_p8 = pnand %p1141_p7, %p1323_p10  ;;  %s1146_s2 = scalar_lea.vmem %s1145_s18, 512 }
 0x260   : > { %p1147_p11 = scmp.lt.s32.totalorder %s1444_s24, %s1145_s18  ;;  %p1148_p13 = scmp.lt.s32.totalorder %s1146_s2, %s1140_s0 }
 0x261   : > { %s954_s26 = sshll.u32 %s765_s20, 8  ;;  %p1143_p9 = pneg %p1142_p8 }
 0x262   : > { %s1449_s30 = scalar_lea.hbm %s1502_s11, %s954_s26  ;;  %p1149_p0 = por %p1148_p13, %p1147_p11 }
 0x264   : > { %p1150_p1 = pnand %p1149_p0, %p1143_p9 }
 0x266   : > { %1153 = shalt.err (!%p1150_p1)
}
 0x267   : > { %s1154_s13 = scalar_lea.hbm %s1449_s30, 256  ;;  %s1158_s14 = scalar_lea.hbm %s1502_s11, 512 }
 0x268   : > { %p1155_p2 = scmp.ne.s32.totalorder %s1449_s30, %s1154_s13  ;;  %p1159_p5 = scmp.lt.u32.totalorder %s1449_s30, %s1502_s11 }
 0x269   : > { %p1160_p6 = scmp.lt.u32.totalorder %s1158_s14, %s1154_s13  ;;  %p1162_p8 = scmp.lt.u32.totalorder %s1154_s13, %s1449_s30 }
 0x26a   : > { %p1156_p3 = pnand %p1155_p2, %p1323_p10 }
 0x26b   : > { %p1161_p7 = por %p1160_p6, %p1159_p5 }
 0x26c   : > { %p1157_p4 = pneg %p1156_p3 }
 0x26d   : > { %p1163_p9 = por %p1162_p8, %p1161_p7 }
 0x26f   : > { %p1164_p11 = pnand %p1163_p9, %p1157_p4 }
 0x271   : > { %1167 = shalt.err (!%p1164_p11)
}
 0x272   : > { %s1215_s1 = smov 128   ;;  %s1216_s28 = smov 8  }
 0x273   : > { %1023 = dma.vmem_to_hbm [thread:$0]  (%p1323_p10), %s1444_s24, 256, %s1449_s30, %s1453_s21, %s1215_s1, %s1215_s1, %s1216_s28  }
 0x274 PF: > { %s1528_s4 = sld [smem:[#allocation15_spill]]  ;;  %s1529_s7 = sld [smem:[#allocation13_spill]] }
 0x27a   : > { %p1029_p13 = scmp.ge.s32.totalorder %s1528_s4, 2  ;;  %s787_s3 = sand.u32 1, %s1529_s7  }
 0x27b   : > { %s788_s20 = scalar_lea.sflag [#allocation9], %s787_s3 }
 0x27c   : > { %p1026_p0 = pnand %p1029_p13, %p1328_p12 }
 0x27e   : > { %1187 = dma.done.wait (!%p1026_p0), %s788_s20, 256  }
 0x27f   : > { %1189 = vsyncadd (!%p1026_p0), %s788_s20, 4294967040  ;;  %s1531_s17 = sld [smem:[#allocation16_spill]]  ;;  %s1532_s26 = sld [smem:[#allocation14_spill]] }
 0x280   : > { %s1533_s16 = sld [smem:[#allocation18_spill]]  ;;  %s1534_s3 = smov %s1196_s15 }
 0x285   : > { %p39_p1 = scmp.ge.s32.totalorder %s1531_s17, 4   ;;  %s1535_s15 = smov %s1532_s26 }
 0x287   :  { %41 = sbr.rel (!%p39_p1) target bundleno = 51 (0x33), region = 109 }
 0x28e   :  { %793 = vsyncpa [#allocation9], 1 }
 0x28f   :  { %795 = vsyncpa [#allocation9 + $0x1], 1 }

</bundles_post_ra>
